<compile_context>
chip_gen: v7x
topology: tpu7x:2x2x1
jax: 0.10.0
libtpu: 0.0.40
codegen_flags: <defaults>
</compile_context>

<pallas_src>
import functools

import jax
import jax.numpy as jnp
import numpy as np
from jax import lax
from jax.experimental import pallas as pl
from jax.experimental.pallas import tpu as pltpu


@functools.lru_cache(maxsize=1)
def _vmem_limit_bytes():
    """Per-generation scoped-VMEM limit: ~3/4 of physical, capped at 100 MiB."""
    try:
        phys = int(pltpu.get_tpu_info().vmem_capacity_bytes)
    except Exception:  # noqa: BLE001 - fall back to a limit that is safe everywhere
        return 48 * 1024 * 1024
    return min((phys * 3) // 4, 100 * 1024 * 1024)


# ---------------- kernel 1: fused qkv 1x1 conv + depthwise 3x3 -------------- #

def _qkv_dw_kernel(xb_ref, xt_ref, xbt_ref, cmask_ref, wqkv_ref, wdw_ref, bdw_ref,
                   o_ref, ext_ref, *, W, Hb, Hr):
    i = pl.program_id(1)
    nb = pl.num_programs(1)
    C = xb_ref.shape[1]
    n_out = Hb * W
    L = (Hb + 2) * W                    # top halo row + band + bottom halo row

    band = xb_ref[0].astype(jnp.float32).reshape(C, n_out)
    top_row = xt_ref[0][:, Hr - 1, :].astype(jnp.float32)       # (C, W)
    bot_row = xbt_ref[0][:, 0, :].astype(jnp.float32)           # (C, W)
    # Zero halo rows at the image top/bottom -> exactly the conv's zero padding,
    # so no row-boundary masks are needed in the tap loop.
    top_row = top_row * (i > 0).astype(jnp.float32)
    bot_row = bot_row * (i < nb - 1).astype(jnp.float32)

    # Assemble [0 | top | band | bottom | 0] in VMEM.  The two zero columns make
    # every tap a static, in-bounds slice; the corner garbage they would have
    # produced is column-masked anyway.
    zcol = jnp.zeros((C, 1), jnp.float32)
    ext_ref[:, 0:1] = zcol
    ext_ref[:, 1:1 + W] = top_row
    ext_ref[:, 1 + W:1 + W + n_out] = band
    ext_ref[:, 1 + W + n_out:1 + L] = bot_row
    ext_ref[:, 1 + L:] = zcol

    # 1x1 qkv conv on the extended band (zero columns stay zero through the matmul).
    qkv = jnp.dot(wqkv_ref[...].astype(jnp.float32), ext_ref[...],
                  preferred_element_type=jnp.float32)            # (3C, L + 2)

    # Precomputed column masks (no in-kernel iota / div / mod).
    maskL = cmask_ref[0:1, :]           # 1.0 where col >= 1      (dj = -1 in-image)
    maskR = cmask_ref[1:2, :]           # 1.0 where col <= W - 2  (dj = +1 in-image)

    acc = qkv[:, 1 + W:1 + W + n_out] * wdw_ref[4].astype(jnp.float32)
    for di in (-1, 0, 1):
        for dj in (-1, 0, 1):
            if di == 0 and dj == 0:
                continue
            start = 1 + W + di * W + dj
            tap = qkv[:, start:start + n_out]
            if dj == -1:
                tap = tap * maskL
            elif dj == 1:
                tap = tap * maskR
            acc = acc + tap * wdw_ref[(di + 1) * 3 + (dj + 1)].astype(jnp.float32)

    acc = acc + bdw_ref[...].astype(jnp.float32)
    o_ref[...] = acc[None].astype(o_ref.dtype)


def _pick_band_h(H, W, C, requested=None):
    """Row-band height: Hb | H, Hb % 8 == 0 and (Hb*W) % 128 == 0 (so both the
    4-D input band and the flattened, lane-dense output block are tileable),
    sized so the f32 (3C, (Hb+2)*W) working block stays around <= 2 MiB."""
    if requested is not None:
        Hb = int(requested)
        if H % Hb != 0:
            raise ValueError(f"band_h={Hb} must divide H={H}")
        if Hb != H and (Hb % 8 != 0 or (Hb * W) % 128 != 0):
            raise ValueError("band_h must be a multiple of 8 with band_h*W % 128 == 0 "
                             "(or equal to H)")
        return Hb
    cands = [h for h in range(8, H + 1, 8) if H % h == 0 and (h * W) % 128 == 0]
    if not cands:
        return H                         # single band (tiny / oddly shaped images)
    cap = 2 * 1024 * 1024
    best = cands[0]
    for h in cands:
        if 12 * C * (h + 2) * W <= cap:  # 3C * (h+2) * W * 4 bytes
            best = h
    return best


def fused_qkv_dwconv(x, w_qkv, w_dw, b_dw, *, band_h=None, out_dtype=None):
    """qkv = dwconv3x3(conv1x1(x)), fused and row-band tiled.
    x: (B, C, H, W) -> qkv: (B, 3C, H*W) in `out_dtype` (bf16 for streaming)."""
    B, C, H, W = x.shape
    C3 = w_qkv.shape[0]
    out_dtype = x.dtype if out_dtype is None else out_dtype

    Hb = _pick_band_h(H, W, C, requested=band_h)
    nb = H // Hb
    Hr = 8 if Hb % 8 == 0 else Hb        # halo fetch granularity (sublane aligned)
    hbr, nhr = Hb // Hr, H // Hr

    # Column masks for the dj = -1 / +1 taps, precomputed host-side.
    col = np.arange(Hb * W) % W
    cmask = jnp.asarray(np.stack([col >= 1, col <= W - 2]).astype(np.float32))

    # Depthwise taps as (9, 3C, 1): each tap weight broadcasts over the lane axis.
    w_taps = jnp.transpose(w_dw.reshape(C3, 9), (1, 0))[:, :, None]
    bias = b_dw.reshape(C3, 1)

    kern = functools.partial(_qkv_dw_kernel, W=W, Hb=Hb, Hr=Hr)
    return pl.pallas_call(
        kern,
        out_shape=jax.ShapeDtypeStruct((B, C3, H * W), out_dtype),
        grid=(B, nb),
        in_specs=[
            # band rows [i*Hb, (i+1)*Hb)
            pl.BlockSpec((1, C, Hb, W), lambda b, i: (b, 0, i, 0)),
            # 8-row block whose LAST row is the top halo row (i*Hb - 1), clamped
            pl.BlockSpec((1, C, Hr, W),
                         lambda b, i: (b, 0, jnp.maximum(i * hbr - 1, 0), 0)),
            # 8-row block whose FIRST row is the bottom halo row ((i+1)*Hb), clamped
            pl.BlockSpec((1, C, Hr, W),
                         lambda b, i: (b, 0, jnp.minimum((i + 1) * hbr, nhr - 1), 0)),
            pl.BlockSpec((2, Hb * W), lambda b, i: (0, 0)),        # column masks
            pl.BlockSpec((C3, C), lambda b, i: (0, 0)),            # 1x1 qkv weights
            pl.BlockSpec((9, C3, 1), lambda b, i: (0, 0, 0)),      # depthwise taps
            pl.BlockSpec((C3, 1), lambda b, i: (0, 0)),            # depthwise bias
        ],
        out_specs=pl.BlockSpec((1, C3, Hb * W), lambda b, i: (b, 0, i)),
        scratch_shapes=[pltpu.VMEM((C, (Hb + 2) * W + 2), jnp.float32)],
        compiler_params=pltpu.CompilerParams(
            dimension_semantics=("parallel", "parallel"),
            vmem_limit_bytes=_vmem_limit_bytes(),
        ),
    )(x, x, x, cmask, w_qkv, w_taps, bias)


# --------- kernel 2: attention weights (streamed over HW) + project_out ------ #

def _attn_weights_kernel(qk_ref, temp_ref, wproj_ref, m_ref,
                         g_acc, qsq_acc, ksq_acc, *, head_dim):
    t = pl.program_id(1)

    @pl.when(t == 0)
    def _():
        g_acc[...] = jnp.zeros_like(g_acc)
        qsq_acc[...] = jnp.zeros_like(qsq_acc)
        ksq_acc[...] = jnp.zeros_like(ksq_acc)

    C = g_acc.shape[0]
    qk = qk_ref[0]                                   # (2C, T) in the streaming dtype
    q, k = qk[:C], qk[C:]
    # Gram matrix straight on the MXU in the streaming dtype, f32 accumulation.
    # TODO(synk): at large C / MXU-bound, accumulate only the per-head diagonal
    # blocks (batched per-head dot) instead of the full CxC Gram.
    g_acc[...] += lax.dot_general(q, k, (((1,), (1,)), ((), ())),
                                  preferred_element_type=jnp.float32)
    qf = q.astype(jnp.float32)
    kf = k.astype(jnp.float32)
    qsq_acc[...] += jnp.sum(qf * qf, axis=-1, keepdims=True)            # (C, 1)
    # ||k||^2 accumulated directly in a (1, C) row layout (consumed as column scale).
    ksq_acc[...] += lax.dot_general(jnp.ones((1, qk.shape[1]), jnp.float32), kf * kf,
                                    (((1,), (1,)), ((), ())),
                                    preferred_element_type=jnp.float32)  # (1, C)

    @pl.when(t == pl.num_programs(1) - 1)
    def _():
        # F.normalize: x / max(||x||, 1e-12)  ==  x * rsqrt(max(||x||^2, 1e-24))
        inv_q = lax.rsqrt(jnp.maximum(qsq_acc[...], 1e-24))              # (C, 1)
        inv_k = lax.rsqrt(jnp.maximum(ksq_acc[...], 1e-24))              # (1, C)
        attn = g_acc[...] * (inv_q * temp_ref[...]) * inv_k              # row+col scale

        # Heads are stacked on the channel axis -> softmax only within a head block.
        ri = lax.broadcasted_iota(jnp.int32, (C, C), 0)
        ci = lax.broadcasted_iota(jnp.int32, (C, C), 1)
        head_mask = (ri // head_dim) == (ci // head_dim)
        attn = jnp.where(head_mask, attn, -1e30)                         # f32 softmax
        attn = attn - jnp.max(attn, axis=-1, keepdims=True)
        e = jnp.exp(attn)
        p = e * pl.reciprocal(jnp.sum(e, axis=-1, keepdims=True), approx=False)

        # fold project_out: y = w_proj @ (p @ v) = (w_proj @ p) @ v
        m = jnp.dot(wproj_ref[...].astype(jnp.float32), p,
                    preferred_element_type=jnp.float32)
        m_ref[...] = m[None].astype(m_ref.dtype)


def attn_weights(qkv, temp_rows, w_proj, *, head_dim, hw_tile):
    B, C3, HW = qkv.shape
    C = C3 // 3
    if HW % hw_tile != 0:
        raise ValueError(f"hw_tile={hw_tile} must divide H*W={HW}")
    n_t = HW // hw_tile
    kern = functools.partial(_attn_weights_kernel, head_dim=head_dim)
    # TODO(synk): on v7x with B == 1, split the HW reduction over a second
    # 'parallel' axis (+ tiny combine) so both TensorCores stream qkv.
    return pl.pallas_call(
        kern,
        out_shape=jax.ShapeDtypeStruct((B, C, C), jnp.float32),
        grid=(B, n_t),
        in_specs=[
            # q and k fetched as ONE contiguous (2C, tile) block per step
            pl.BlockSpec((1, 2 * C, hw_tile), lambda b, t: (b, 0, t)),
            pl.BlockSpec((C, 1), lambda b, t: (0, 0)),               # temperature/row
            pl.BlockSpec((C, C), lambda b, t: (0, 0)),               # w_proj (resident)
        ],
        out_specs=pl.BlockSpec((1, C, C), lambda b, t: (b, 0, 0)),
        scratch_shapes=[
            pltpu.VMEM((C, C), jnp.float32),
            pltpu.VMEM((C, 1), jnp.float32),
            pltpu.VMEM((1, C), jnp.float32),
        ],
        compiler_params=pltpu.CompilerParams(
            dimension_semantics=("parallel", "arbitrary"),
            vmem_limit_bytes=_vmem_limit_bytes(),
        ),
    )(qkv, temp_rows, w_proj)


# ---------------- kernel 3: apply (w_proj @ softmax) to v, tiled ------------- #

def _apply_attn_kernel(m_ref, v_ref, o_ref):
    v = v_ref[0]
    m = m_ref[0].astype(v.dtype)        # bf16 MXU when streaming bf16, f32 otherwise
    o = jnp.dot(m, v, preferred_element_type=jnp.float32)
    o_ref[...] = o[None].astype(o_ref.dtype)


def apply_attn(m, qkv, *, hw_tile, out_dtype):
    B, C3, HW = qkv.shape
    C = C3 // 3
    if HW % hw_tile != 0:
        raise ValueError(f"hw_tile={hw_tile} must divide H*W={HW}")
    n_t = HW // hw_tile
    return pl.pallas_call(
        _apply_attn_kernel,
        out_shape=jax.ShapeDtypeStruct((B, C, HW), out_dtype),
        grid=(B, n_t),
        in_specs=[
            pl.BlockSpec((1, C, C), lambda b, t: (b, 0, 0)),
            pl.BlockSpec((1, C, hw_tile), lambda b, t: (b, 2, t)),   # v slice of qkv
        ],
        out_specs=pl.BlockSpec((1, C, hw_tile), lambda b, t: (b, 0, t)),
        compiler_params=pltpu.CompilerParams(
            dimension_semantics=("parallel", "parallel"),
            vmem_limit_bytes=_vmem_limit_bytes(),
        ),
    )(m, qkv)


# ------------------------------- Forward pass ------------------------------- #

def _pick_hw_tile(HW, max_tile=4096):
    """Largest divisor of HW that is a multiple of 128 and <= max_tile."""
    if HW % 128 != 0 or HW <= 128:
        # TODO(synk): pad HW up to a multiple of 128 for production-shaped images;
        # the single full-width tile fallback keeps correctness for small inputs.
        return HW
    t = min(max_tile, HW)
    t -= t % 128
    while HW % t != 0:
        t -= 128
    return t


def attention_forward(x, params, num_heads, *, hw_tile=None, band_h=None,
                      qkv_dtype=jnp.bfloat16):
    B, C, H, W = x.shape
    assert C % num_heads == 0, "dim must be divisible by num_heads"
    head_dim = C // num_heads
    HW = H * W

    # kernel 1: fused qkv 1x1 + depthwise 3x3, row-band tiled, streamed in qkv_dtype
    qkv = fused_qkv_dwconv(x, params["w_qkv"], params["w_dw"], params["b_dw"],
                           band_h=band_h, out_dtype=qkv_dtype)     # (B, 3C, HW)

    tile = _pick_hw_tile(HW) if hw_tile is None else hw_tile
    temp_rows = jnp.repeat(params["temperature"].reshape(num_heads),
                           head_dim).reshape(C, 1).astype(jnp.float32)

    m = attn_weights(qkv, temp_rows, params["w_proj"],
                     head_dim=head_dim, hw_tile=tile)              # (B, C, C)
    out = apply_attn(m, qkv, hw_tile=tile, out_dtype=x.dtype)      # (B, C, HW)
    return out.reshape(B, C, H, W)


# --------------------------- Pure-JAX reference ------------------------------ #

def attention_reference(x, params, num_heads):
    B, C, H, W = x.shape
    head_dim = C // num_heads
    dn = ("NCHW", "OIHW", "NCHW")

    qkv = lax.conv_general_dilated(
        x, params["w_qkv"][:, :, None, None], (1, 1), "VALID",
        dimension_numbers=dn)
    qkv = lax.conv_general_dilated(
        qkv, params["w_dw"][:, None, :, :], (1, 1), ((1, 1), (1, 1)),
        dimension_numbers=dn, feature_group_count=3 * C)
    qkv = qkv + params["b_dw"][None, :, None, None]

    q, k, v = jnp.split(qkv, 3, axis=1)
    q = q.reshape(B, num_heads, head_dim, H * W)
    k = k.reshape(B, num_heads, head_dim, H * W)
    v = v.reshape(B, num_heads, head_dim, H * W)

    qn = q / jnp.maximum(jnp.linalg.norm(q, axis=-1, keepdims=True), 1e-12)
    kn = k / jnp.maximum(jnp.linalg.norm(k, axis=-1, keepdims=True), 1e-12)
    attn = jnp.einsum("bhdn,bhen->bhde", qn, kn) * params["temperature"][None]
    attn = jax.nn.softmax(attn, axis=-1)
    out = jnp.einsum("bhde,bhen->bhdn", attn, v).reshape(B, C, H, W)

    out = lax.conv_general_dilated(
        out, params["w_proj"][:, :, None, None], (1, 1), "VALID",
        dimension_numbers=dn)
    return out


# ----------------------------------- Main ------------------------------------ #

if __name__ == "__main__":
    dim, num_heads = 16, 4              # head_dim = 4
    B, H, W = 2, 16, 16

    key = jax.random.PRNGKey(0)
    k1, k2, k3, k4, k5 = jax.random.split(key, 5)
    params = {
        # qkv: Conv2d(dim, 3*dim, 1, bias=False) -> (3*dim, dim)
        "w_qkv": 0.1 * jax.random.normal(k1, (3 * dim, dim), jnp.float32),
        # qkv_dwconv: Conv2d(3*dim, 3*dim, 3, groups=3*dim) -> (3*dim, 3, 3) + bias
        "w_dw": 0.1 * jax.random.normal(k2, (3 * dim, 3, 3), jnp.float32),
        "b_dw": 0.1 * jax.random.normal(k3, (3 * dim,), jnp.float32),
        # project_out: Conv2d(dim, dim, 1, bias=False) -> (dim, dim)
        "w_proj": 0.1 * jax.random.normal(k4, (dim, dim), jnp.float32),
        # temperature init = ones(num_heads, 1, 1)
        "temperature": jnp.ones((num_heads, 1, 1), jnp.float32),
    }

    x = jax.random.normal(k5, (B, dim, H, W), jnp.float32)

    ref = jax.block_until_ready(attention_reference(x, params, num_heads))

    # band_h=8 -> 2 row bands (exercises the halo path); hw_tile=128 -> 2 spatial
    # tiles (exercises the streamed Gram accumulation).
    # 1) f32 streaming path: strict parity with the f32 reference.
    out_f32 = jax.block_until_ready(
        attention_forward(x, params, num_heads, hw_tile=128, band_h=8,
                          qkv_dtype=jnp.float32))
    # 2) default bf16 streaming path (half the HBM traffic on the attention passes).
    out_bf16 = jax.block_until_ready(
        attention_forward(x, params, num_heads, hw_tile=128, band_h=8))

    assert out_f32.shape == (B, dim, H, W)
    if not np.allclose(np.asarray(out_f32), np.asarray(ref), rtol=1e-4, atol=1e-4):
        raise SystemExit("Pallas kernel (f32 streaming) mismatch vs reference")
    if not np.allclose(np.asarray(out_bf16), np.asarray(ref), rtol=3e-2, atol=3e-2):
        raise SystemExit("Pallas kernel (bf16 streaming) mismatch vs reference")
    print("KERNEL_OK")
</pallas_src>

<mosaic_0001>
module attributes {stable_mosaic.version = 11 : i64} {
  func.func @_qkv_dw_kernel(%arg0: i32, %arg1: i32, %arg2: memref<1x16x8x16xf32, #tpu.memory_space<vmem>>, %arg3: memref<1x16x8x16xf32, #tpu.memory_space<vmem>>, %arg4: memref<1x16x8x16xf32, #tpu.memory_space<vmem>>, %arg5: memref<2x128xf32, #tpu.memory_space<vmem>>, %arg6: memref<48x16xf32, #tpu.memory_space<vmem>>, %arg7: memref<9x48x1xf32, #tpu.memory_space<vmem>>, %arg8: memref<48x1xf32, #tpu.memory_space<vmem>>, %arg9: memref<1x48x128xf32, #tpu.memory_space<vmem>>, %arg10: memref<16x162xf32, #tpu.memory_space<vmem>>) attributes {dimension_semantics = [#tpu.dimension_semantics<parallel>, #tpu.dimension_semantics<parallel>], iteration_bounds = array<i64: 2, 2>, scalar_prefetch = 0 : i64, scratch_operands = 1 : i64, tpu.core_type = #tpu.core_type<tc>, window_params = [{transform_indices = @transform_0, window_bounds = array<i64: 1, 16, 8, 16>}, {transform_indices = @transform_1, window_bounds = array<i64: 1, 16, 8, 16>}, {transform_indices = @transform_2, window_bounds = array<i64: 1, 16, 8, 16>}, {pipeline_mode = #tpu.pipeline_mode<synchronous>, transform_indices = @transform_3, window_bounds = array<i64: 2, 128>}, {pipeline_mode = #tpu.pipeline_mode<synchronous>, transform_indices = @transform_4, window_bounds = array<i64: 48, 16>}, {pipeline_mode = #tpu.pipeline_mode<synchronous>, transform_indices = @transform_5, window_bounds = array<i64: 9, 48, 1>}, {pipeline_mode = #tpu.pipeline_mode<synchronous>, transform_indices = @transform_6, window_bounds = array<i64: 48, 1>}, {transform_indices = @transform_7, window_bounds = array<i64: 1, 48, 128>}]} {
    %c0 = arith.constant 0 : index
    %c0_0 = arith.constant 0 : index
    %c0_1 = arith.constant 0 : index
    %c0_2 = arith.constant 0 : index
    %0 = vector.load %arg2[%c0, %c0_0, %c0_1, %c0_2] : memref<1x16x8x16xf32, #tpu.memory_space<vmem>>, vector<1x16x8x16xf32>
    %1 = vector.shape_cast %0 : vector<1x16x8x16xf32> to vector<16x8x16xf32>
    %2 = vector.shape_cast %1 : vector<16x8x16xf32> to vector<16x128xf32>
    %c0_3 = arith.constant 0 : index
    %c0_4 = arith.constant 0 : index
    %c0_5 = arith.constant 0 : index
    %c0_6 = arith.constant 0 : index
    %3 = vector.load %arg3[%c0_3, %c0_4, %c0_5, %c0_6] : memref<1x16x8x16xf32, #tpu.memory_space<vmem>>, vector<1x16x8x16xf32>
    %4 = vector.shape_cast %3 : vector<1x16x8x16xf32> to vector<16x8x16xf32>
    %5 = vector.extract_strided_slice %4 {offsets = [0, 7, 0], sizes = [16, 1, 16], strides = [1, 1, 1]} : vector<16x8x16xf32> to vector<16x1x16xf32>
    %6 = vector.shape_cast %5 : vector<16x1x16xf32> to vector<16x16xf32>
    %c0_7 = arith.constant 0 : index
    %c0_8 = arith.constant 0 : index
    %c0_9 = arith.constant 0 : index
    %c0_10 = arith.constant 0 : index
    %7 = vector.load %arg4[%c0_7, %c0_8, %c0_9, %c0_10] : memref<1x16x8x16xf32, #tpu.memory_space<vmem>>, vector<1x16x8x16xf32>
    %8 = vector.shape_cast %7 : vector<1x16x8x16xf32> to vector<16x8x16xf32>
    %9 = vector.extract_strided_slice %8 {offsets = [0, 0, 0], sizes = [16, 1, 16], strides = [1, 1, 1]} : vector<16x8x16xf32> to vector<16x1x16xf32>
    %10 = vector.shape_cast %9 : vector<16x1x16xf32> to vector<16x16xf32>
    %c0_i32 = arith.constant 0 : i32
    %11 = arith.cmpi sgt, %arg1, %c0_i32 : i32
    %12 = arith.extui %11 : i1 to i32
    %13 = arith.sitofp %12 : i32 to f32
    %14 = vector.broadcast %13 : f32 to vector<16x16xf32>
    %15 = arith.mulf %6, %14 : vector<16x16xf32>
    %c1_i32 = arith.constant 1 : i32
    %16 = arith.cmpi slt, %arg1, %c1_i32 : i32
    %17 = arith.extui %16 : i1 to i32
    %18 = arith.sitofp %17 : i32 to f32
    %19 = vector.broadcast %18 : f32 to vector<16x16xf32>
    %20 = arith.mulf %10, %19 : vector<16x16xf32>
    %cst = arith.constant 0.000000e+00 : f32
    %21 = vector.broadcast %cst : f32 to vector<16x1xf32>
    %c0_11 = arith.constant 0 : index
    %c0_12 = arith.constant 0 : index
    %22 = vector.load %arg10[%c0_11, %c0_12] : memref<16x162xf32, #tpu.memory_space<vmem>>, vector<16x1xf32>
    tpu.vector_store %arg10[%c0_11, %c0_12], %21 {strides = array<i32>} : memref<16x162xf32, #tpu.memory_space<vmem>>, vector<16x1xf32>,
    %c0_13 = arith.constant 0 : index
    %c1 = arith.constant 1 : index
    %23 = vector.load %arg10[%c0_13, %c1] : memref<16x162xf32, #tpu.memory_space<vmem>>, vector<16x16xf32>
    tpu.vector_store %arg10[%c0_13, %c1], %15 {strides = array<i32>} : memref<16x162xf32, #tpu.memory_space<vmem>>, vector<16x16xf32>,
    %c0_14 = arith.constant 0 : index
    %c17 = arith.constant 17 : index
    %24 = vector.load %arg10[%c0_14, %c17] : memref<16x162xf32, #tpu.memory_space<vmem>>, vector<16x128xf32>
    tpu.vector_store %arg10[%c0_14, %c17], %2 {strides = array<i32>} : memref<16x162xf32, #tpu.memory_space<vmem>>, vector<16x128xf32>,
    %c0_15 = arith.constant 0 : index
    %c145 = arith.constant 145 : index
    %25 = vector.load %arg10[%c0_15, %c145] : memref<16x162xf32, #tpu.memory_space<vmem>>, vector<16x16xf32>
    tpu.vector_store %arg10[%c0_15, %c145], %20 {strides = array<i32>} : memref<16x162xf32, #tpu.memory_space<vmem>>, vector<16x16xf32>,
    %c0_16 = arith.constant 0 : index
    %c161 = arith.constant 161 : index
    %26 = vector.load %arg10[%c0_16, %c161] : memref<16x162xf32, #tpu.memory_space<vmem>>, vector<16x1xf32>
    tpu.vector_store %arg10[%c0_16, %c161], %21 {strides = array<i32>} : memref<16x162xf32, #tpu.memory_space<vmem>>, vector<16x1xf32>,
    %c0_17 = arith.constant 0 : index
    %c0_18 = arith.constant 0 : index
    %27 = vector.load %arg6[%c0_17, %c0_18] : memref<48x16xf32, #tpu.memory_space<vmem>>, vector<48x16xf32>
    %c0_19 = arith.constant 0 : index
    %c0_20 = arith.constant 0 : index
    %28 = vector.load %arg10[%c0_19, %c0_20] : memref<16x162xf32, #tpu.memory_space<vmem>>, vector<16x162xf32>
    %cst_21 = arith.constant dense<0.000000e+00> : vector<48x162xf32>
    %29 = tpu.matmul %27, %28, %cst_21 {dimension_numbers = #tpu.dot_dimension_numbers<[1], [0], [0], [1], [0, 0, 1, 1], [], []>} : vector<48x16xf32>, vector<16x162xf32>, vector<48x162xf32> -> vector<48x162xf32>
    %c0_22 = arith.constant 0 : index
    %c0_23 = arith.constant 0 : index
    %30 = vector.load %arg5[%c0_22, %c0_23] : memref<2x128xf32, #tpu.memory_space<vmem>>, vector<1x128xf32>
    %c1_24 = arith.constant 1 : index
    %c0_25 = arith.constant 0 : index
    %31 = vector.load %arg5[%c1_24, %c0_25] : memref<2x128xf32, #tpu.memory_space<vmem>>, vector<1x128xf32>
    %32 = vector.extract_strided_slice %29 {offsets = [0, 17], sizes = [48, 128], strides = [1, 1]} : vector<48x162xf32> to vector<48x128xf32>
    %c4 = arith.constant 4 : index
    %c0_26 = arith.constant 0 : index
    %c0_27 = arith.constant 0 : index
    %33 = vector.load %arg7[%c4, %c0_26, %c0_27] : memref<9x48x1xf32, #tpu.memory_space<vmem>>, vector<1x48x1xf32>
    %34 = vector.shape_cast %33 : vector<1x48x1xf32> to vector<48x1xf32>
    %35 = vector.broadcast %34 : vector<48x1xf32> to vector<48x128xf32>
    %36 = arith.mulf %32, %35 : vector<48x128xf32>
    %37 = vector.extract_strided_slice %29 {offsets = [0, 0], sizes = [48, 128], strides = [1, 1]} : vector<48x162xf32> to vector<48x128xf32>
    %38 = vector.broadcast %30 : vector<1x128xf32> to vector<48x128xf32>
    %39 = arith.mulf %37, %38 : vector<48x128xf32>
    %c0_28 = arith.constant 0 : index
    %c0_29 = arith.constant 0 : index
    %c0_30 = arith.constant 0 : index
    %40 = vector.load %arg7[%c0_28, %c0_29, %c0_30] : memref<9x48x1xf32, #tpu.memory_space<vmem>>, vector<1x48x1xf32>
    %41 = vector.shape_cast %40 : vector<1x48x1xf32> to vector<48x1xf32>
    %42 = vector.broadcast %41 : vector<48x1xf32> to vector<48x128xf32>
    %43 = arith.mulf %39, %42 : vector<48x128xf32>
    %44 = arith.addf %36, %43 : vector<48x128xf32>
    %45 = vector.extract_strided_slice %29 {offsets = [0, 1], sizes = [48, 128], strides = [1, 1]} : vector<48x162xf32> to vector<48x128xf32>
    %c1_31 = arith.constant 1 : index
    %c0_32 = arith.constant 0 : index
    %c0_33 = arith.constant 0 : index
    %46 = vector.load %arg7[%c1_31, %c0_32, %c0_33] : memref<9x48x1xf32, #tpu.memory_space<vmem>>, vector<1x48x1xf32>
    %47 = vector.shape_cast %46 : vector<1x48x1xf32> to vector<48x1xf32>
    %48 = vector.broadcast %47 : vector<48x1xf32> to vector<48x128xf32>
    %49 = arith.mulf %45, %48 : vector<48x128xf32>
    %50 = arith.addf %44, %49 : vector<48x128xf32>
    %51 = vector.extract_strided_slice %29 {offsets = [0, 2], sizes = [48, 128], strides = [1, 1]} : vector<48x162xf32> to vector<48x128xf32>
    %52 = vector.broadcast %31 : vector<1x128xf32> to vector<48x128xf32>
    %53 = arith.mulf %51, %52 : vector<48x128xf32>
    %c2 = arith.constant 2 : index
    %c0_34 = arith.constant 0 : index
    %c0_35 = arith.constant 0 : index
    %54 = vector.load %arg7[%c2, %c0_34, %c0_35] : memref<9x48x1xf32, #tpu.memory_space<vmem>>, vector<1x48x1xf32>
    %55 = vector.shape_cast %54 : vector<1x48x1xf32> to vector<48x1xf32>
    %56 = vector.broadcast %55 : vector<48x1xf32> to vector<48x128xf32>
    %57 = arith.mulf %53, %56 : vector<48x128xf32>
    %58 = arith.addf %50, %57 : vector<48x128xf32>
    %59 = vector.extract_strided_slice %29 {offsets = [0, 16], sizes = [48, 128], strides = [1, 1]} : vector<48x162xf32> to vector<48x128xf32>
    %60 = vector.broadcast %30 : vector<1x128xf32> to vector<48x128xf32>
    %61 = arith.mulf %59, %60 : vector<48x128xf32>
    %c3 = arith.constant 3 : index
    %c0_36 = arith.constant 0 : index
    %c0_37 = arith.constant 0 : index
    %62 = vector.load %arg7[%c3, %c0_36, %c0_37] : memref<9x48x1xf32, #tpu.memory_space<vmem>>, vector<1x48x1xf32>
    %63 = vector.shape_cast %62 : vector<1x48x1xf32> to vector<48x1xf32>
    %64 = vector.broadcast %63 : vector<48x1xf32> to vector<48x128xf32>
    %65 = arith.mulf %61, %64 : vector<48x128xf32>
    %66 = arith.addf %58, %65 : vector<48x128xf32>
    %67 = vector.extract_strided_slice %29 {offsets = [0, 18], sizes = [48, 128], strides = [1, 1]} : vector<48x162xf32> to vector<48x128xf32>
    %68 = vector.broadcast %31 : vector<1x128xf32> to vector<48x128xf32>
    %69 = arith.mulf %67, %68 : vector<48x128xf32>
    %c5 = arith.constant 5 : index
    %c0_38 = arith.constant 0 : index
    %c0_39 = arith.constant 0 : index
    %70 = vector.load %arg7[%c5, %c0_38, %c0_39] : memref<9x48x1xf32, #tpu.memory_space<vmem>>, vector<1x48x1xf32>
    %71 = vector.shape_cast %70 : vector<1x48x1xf32> to vector<48x1xf32>
    %72 = vector.broadcast %71 : vector<48x1xf32> to vector<48x128xf32>
    %73 = arith.mulf %69, %72 : vector<48x128xf32>
    %74 = arith.addf %66, %73 : vector<48x128xf32>
    %75 = vector.extract_strided_slice %29 {offsets = [0, 32], sizes = [48, 128], strides = [1, 1]} : vector<48x162xf32> to vector<48x128xf32>
    %76 = vector.broadcast %30 : vector<1x128xf32> to vector<48x128xf32>
    %77 = arith.mulf %75, %76 : vector<48x128xf32>
    %c6 = arith.constant 6 : index
    %c0_40 = arith.constant 0 : index
    %c0_41 = arith.constant 0 : index
    %78 = vector.load %arg7[%c6, %c0_40, %c0_41] : memref<9x48x1xf32, #tpu.memory_space<vmem>>, vector<1x48x1xf32>
    %79 = vector.shape_cast %78 : vector<1x48x1xf32> to vector<48x1xf32>
    %80 = vector.broadcast %79 : vector<48x1xf32> to vector<48x128xf32>
    %81 = arith.mulf %77, %80 : vector<48x128xf32>
    %82 = arith.addf %74, %81 : vector<48x128xf32>
    %83 = vector.extract_strided_slice %29 {offsets = [0, 33], sizes = [48, 128], strides = [1, 1]} : vector<48x162xf32> to vector<48x128xf32>
    %c7 = arith.constant 7 : index
    %c0_42 = arith.constant 0 : index
    %c0_43 = arith.constant 0 : index
    %84 = vector.load %arg7[%c7, %c0_42, %c0_43] : memref<9x48x1xf32, #tpu.memory_space<vmem>>, vector<1x48x1xf32>
    %85 = vector.shape_cast %84 : vector<1x48x1xf32> to vector<48x1xf32>
    %86 = vector.broadcast %85 : vector<48x1xf32> to vector<48x128xf32>
    %87 = arith.mulf %83, %86 : vector<48x128xf32>
    %88 = arith.addf %82, %87 : vector<48x128xf32>
    %89 = vector.extract_strided_slice %29 {offsets = [0, 34], sizes = [48, 128], strides = [1, 1]} : vector<48x162xf32> to vector<48x128xf32>
    %90 = vector.broadcast %31 : vector<1x128xf32> to vector<48x128xf32>
    %91 = arith.mulf %89, %90 : vector<48x128xf32>
    %c8 = arith.constant 8 : index
    %c0_44 = arith.constant 0 : index
    %c0_45 = arith.constant 0 : index
    %92 = vector.load %arg7[%c8, %c0_44, %c0_45] : memref<9x48x1xf32, #tpu.memory_space<vmem>>, vector<1x48x1xf32>
    %93 = vector.shape_cast %92 : vector<1x48x1xf32> to vector<48x1xf32>
    %94 = vector.broadcast %93 : vector<48x1xf32> to vector<48x128xf32>
    %95 = arith.mulf %91, %94 : vector<48x128xf32>
    %96 = arith.addf %88, %95 : vector<48x128xf32>
    %c0_46 = arith.constant 0 : index
    %c0_47 = arith.constant 0 : index
    %97 = vector.load %arg8[%c0_46, %c0_47] : memref<48x1xf32, #tpu.memory_space<vmem>>, vector<48x1xf32>
    %98 = vector.broadcast %97 : vector<48x1xf32> to vector<48x128xf32>
    %99 = arith.addf %96, %98 : vector<48x128xf32>
    %100 = vector.shape_cast %99 : vector<48x128xf32> to vector<1x48x128xf32>
    %c0_48 = arith.constant 0 : index
    %c0_49 = arith.constant 0 : index
    %c0_50 = arith.constant 0 : index
    %101 = vector.load %arg9[%c0_48, %c0_49, %c0_50] : memref<1x48x128xf32, #tpu.memory_space<vmem>>, vector<1x48x128xf32>
    tpu.vector_store %arg9[%c0_48, %c0_49, %c0_50], %100 {strides = array<i32>} : memref<1x48x128xf32, #tpu.memory_space<vmem>>, vector<1x48x128xf32>,
    return
  }
  func.func @transform_0(%arg0: i32, %arg1: i32) -> (i32, i32, i32, i32) {
    %c0_i32 = arith.constant 0 : i32
    %c0_i32_0 = arith.constant 0 : i32
    %c0_i32_1 = arith.constant 0 : i32
    return %arg0, %c0_i32, %arg1, %c0_i32_0 : i32, i32, i32, i32
  }
  func.func @transform_1(%arg0: i32, %arg1: i32) -> (i32, i32, i32, i32) {
    %c1_i32 = arith.constant 1 : i32
    %0 = arith.muli %arg1, %c1_i32 : i32
    %c1_i32_0 = arith.constant 1 : i32
    %1 = arith.subi %0, %c1_i32_0 : i32
    %c0_i32 = arith.constant 0 : i32
    %2 = arith.maxsi %1, %c0_i32 : i32
    %c0_i32_1 = arith.constant 0 : i32
    %c0_i32_2 = arith.constant 0 : i32
    %c0_i32_3 = arith.constant 0 : i32
    return %arg0, %c0_i32_1, %2, %c0_i32_2 : i32, i32, i32, i32
  }
  func.func @transform_2(%arg0: i32, %arg1: i32) -> (i32, i32, i32, i32) {
    %c1_i32 = arith.constant 1 : i32
    %0 = arith.addi %arg1, %c1_i32 : i32
    %c1_i32_0 = arith.constant 1 : i32
    %1 = arith.muli %0, %c1_i32_0 : i32
    %c1_i32_1 = arith.constant 1 : i32
    %2 = arith.minsi %1, %c1_i32_1 : i32
    %c0_i32 = arith.constant 0 : i32
    %c0_i32_2 = arith.constant 0 : i32
    %c0_i32_3 = arith.constant 0 : i32
    return %arg0, %c0_i32, %2, %c0_i32_2 : i32, i32, i32, i32
  }
  func.func @transform_3(%arg0: i32, %arg1: i32) -> (i32, i32) {
    %c0_i32 = arith.constant 0 : i32
    %c0_i32_0 = arith.constant 0 : i32
    %c0_i32_1 = arith.constant 0 : i32
    return %c0_i32, %c0_i32_0 : i32, i32
  }
  func.func @transform_4(%arg0: i32, %arg1: i32) -> (i32, i32) {
    %c0_i32 = arith.constant 0 : i32
    %c0_i32_0 = arith.constant 0 : i32
    %c0_i32_1 = arith.constant 0 : i32
    return %c0_i32, %c0_i32_0 : i32, i32
  }
  func.func @transform_5(%arg0: i32, %arg1: i32) -> (i32, i32, i32) {
    %c0_i32 = arith.constant 0 : i32
    %c0_i32_0 = arith.constant 0 : i32
    %c0_i32_1 = arith.constant 0 : i32
    %c0_i32_2 = arith.constant 0 : i32
    return %c0_i32, %c0_i32_0, %c0_i32_1 : i32, i32, i32
  }
  func.func @transform_6(%arg0: i32, %arg1: i32) -> (i32, i32) {
    %c0_i32 = arith.constant 0 : i32
    %c0_i32_0 = arith.constant 0 : i32
    %c0_i32_1 = arith.constant 0 : i32
    return %c0_i32, %c0_i32_0 : i32, i32
  }
  func.func @transform_7(%arg0: i32, %arg1: i32) -> (i32, i32, i32) {
    %c0_i32 = arith.constant 0 : i32
    %c0_i32_0 = arith.constant 0 : i32
    return %arg0, %c0_i32, %arg1 : i32, i32, i32
  }
}

</mosaic_0001>

<bundles_post_ra>
// kernel: tpu_custom_call.1
= control target key start
LH: loop header
LB: loop body
LE: loop exit
PB: predicated region body
PF: predicated region fallthrough
CT: control target
= control target key end

     0   :  { %s4533_s0 = inlined_call_operand.vmem [shape: f32[2,16,16,16], index: 0, kind: input, shape index: {}]   ;;  %s4534_s1 = inlined_call_operand.hbm [shape: f32[2,16,16,16], index: 1, kind: input, shape index: {}]   ;;  %s4535_s2 = inlined_call_operand.hbm [shape: f32[2,16,16,16], index: 2, kind: input, shape index: {}]   ;;  %s4536_s3 = inlined_call_operand.vmem [shape: f32[2,128], index: 3, kind: input, shape index: {}]   ;;  %s4537_s4 = inlined_call_operand.vmem [shape: f32[48,16], index: 4, kind: input, shape index: {}]   ;;  %s4538_s5 = inlined_call_operand.vmem [shape: f32[9,48,1], index: 5, kind: input, shape index: {}]   ;;  %s4539_s6 = inlined_call_operand.vmem [shape: f32[48,1], index: 6, kind: input, shape index: {}]   ;;  %s4540_s7 = inlined_call_operand.hbm [shape: f32[2,48,256], index: 7, kind: output, shape index: {}]  }
   0x1   :  { %4562 = sst [smem:[#allocation32_spill]] %s4533_s0 }
   0x2   :  { %4563 = sst [smem:[#allocation33_spill]] %s4534_s1 }
   0x3   :  { %4564 = sst [smem:[#allocation34_spill]] %s4540_s7 }
   0x4   :  { %12 = vsyncpa [#allocation5], 0 }
   0x5   :  { %14 = vsyncpa [#allocation5 + $0x1], 0 }
   0x6   :  { %15 = vsyncpa [#allocation8], 0 }
   0x7   :  { %17 = vsyncpa [#allocation8 + $0x1], 0 }
   0x8   :  { %18 = vsyncpa [#allocation6], 0 }
   0x9   :  { %20 = vsyncpa [#allocation6 + $0x1], 0  ;;  %s3020_s24 = smov 0   ;;  %s3022_s25 = smov 0  }
   0xa   :  { %s3024_s26 = smov 0   ;;  %s3026_s27 = smov 0  }
   0xb   :  { %s3028_s28 = smov 0   ;;  %s3030_s29 = smov 0  }
   0xc   :  { %s3032_s30 = smov 0   ;;  %s3034_s8 = smov 0  }
   0xd   :  { %s3036_s9 = smov 0   ;;  %s3038_s10 = smov 0  }
   0xe   :  { %s3040_s11 = smov 0   ;;  %s3042_s12 = smov 0  }
   0xf   :  { %s3044_s13 = smov 0   ;;  %s3046_s14 = smov 0  }
  0x10 LB: > { %4565 = sst [smem:[#allocation13_spill]] %s2897_s24  ;;  %s35_s17 = sadd.s32 1, %s2941_s12  ;;  %s2949_s14 = sphi %s3046_s14, %s26_s14   ;;  %s2945_s13 = sphi %s3044_s13, %s4631_s13   ;;  %s2941_s12 = sphi %s3042_s12, %s4620_s12   ;;  %s2937_s11 = sphi %s3040_s11, %s4630_s11   ;;  %s2933_s10 = sphi %s3038_s10, %s4619_s10   ;;  %s2929_s9 = sphi %s3036_s9, %s4618_s9   ;;  %s2925_s8 = sphi %s3034_s8, %s4629_s8   ;;  %s2921_s30 = sphi %s3032_s30, %s4616_s30   ;;  %s2917_s29 = sphi %s3030_s29, %s4628_s29   ;;  %s2913_s28 = sphi %s3028_s28, %s4627_s28   ;;  %s2909_s27 = sphi %s3026_s27, %s4626_s27   ;;  %s2905_s26 = sphi %s3024_s26, %s4625_s26   ;;  %s2901_s25 = sphi %s3022_s25, %s4624_s25   ;;  %s2897_s24 = sphi %s3020_s24, %s4623_s24  }
  0x11   : > { %4566 = sst [smem:[#allocation14_spill]] %s2921_s30  ;;  %s38_s18 = sadd.s32 1, %s2945_s13 }
  0x12   : > { %4567 = sst [smem:[#allocation15_spill]] %s2929_s9  ;;  %p36_p0 = scmp.ge.s32.totalorder %s35_s17, 2 }
  0x13   : > { %4568 = sst [smem:[#allocation16_spill]] %s2937_s11  ;;  %s47_s19 = sadd.s32 1, %s2929_s9 }
  0x14   : > { %4569 = sst [smem:[#allocation17_spill]] %s2941_s12  ;;  %p54_p1 = scmp.ne.s32.totalorder %s2929_s9, %s2925_s8 }
  0x15   : > { %p55_p2 = scmp.eq.s32.totalorder %s2949_s14, 0  ;;  %s4633_s17 = smov (%p36_p0, %s35_s17), 0 }
  0x16   : > { %4570 = sst [smem:[#allocation18_spill]] %s4633_s17  ;;  %s4635_s18 = smov (!%p36_p0, %s38_s18), %s2945_s13 }
  0x17   : > { %s43_s20 = ssub.s32 %s2941_s12, %s4633_s17  ;;  %p3108_p3 = por %p55_p2, %p54_p1 }
  0x18   : > { %p40_p4 = scmp.ge.s32.totalorder %s4635_s18, 2  ;;  %s81_s16 = sadd.s32 1, %s2921_s30 }
  0x19   : > { %p88_p6 = scmp.ne.s32.totalorder %s2921_s30, %s2917_s29  ;;  %p94_p8 = scmp.ne.s32.totalorder %s2917_s29, %s2913_s28 }
  0x1a   : > { %s4637_s18 = smov (%p40_p4, %s4635_s18), 0  ;;  %s115_s7 = sadd.s32 1, %s2909_s27 }
  0x1b   : > { %4572 = sst [smem:[#allocation19_spill]] %s4637_s18  ;;  %s42_s22 = ssub.s32 %s2945_s13, %s4637_s18 }
  0x1c   : > { %s44_s23 = sor.u32 %s43_s20, %s42_s22  ;;  %p3124_p7 = por %p88_p6, %p55_p2 }
  0x1d   : > { %p45_p5 = scmp.eq.s32.totalorder %s44_s23, 0  ;;  %p79_p9 = scmp.eq.s32.totalorder %s42_s22, 0 }
  0x1e   : > { %s4575_s20 = sadd.s32 4294967295, %s2949_s14   ;;  %p122_p12 = scmp.ne.s32.totalorder %s2909_s27, %s2905_s26 }
  0x1f   : > { %s3120_s15 = scalar_select %p45_p5, %s2929_s9, %s47_s19  }
  0x20   : > { %p95_p10 = scmp.eq.s32.totalorder %s4575_s20, 0  ;;  %p128_p13 = scmp.ne.s32.totalorder %s2905_s26, %s2901_s25 }
  0x21   : > { %4573 = sst [smem:[#allocation20_spill]] %s3120_s15  ;;  %p3146_p0 = por %p122_p12, %p55_p2 }
  0x22   : > { %s3133_s18 = scalar_select %p79_p9, %s2921_s30, %s81_s16  }
  0x23   : > { %p3135_p11 = por %p95_p10, %p94_p8  ;;  %p3150_p4 = por %p128_p13, %p95_p10 }
  0x24   : > { %4576 = sst [smem:[#allocation21_spill]] %s3133_s18  ;;  %s4580_s28 = smov %s4575_s20 }
  0x25   : > { %s4577_s23 = scalar_select %p3135_p11, 1, 0 }
  0x26   : > { %s4579_s15 = scalar_select %p3150_p4, 1, 0 }
  0x27   : > { %p238_p5 = scmp.eq.s32.totalorder %s4580_s28, 3  ;;  %p243_p6 = scmp.ne.s32.totalorder %s2925_s8, %s2897_s24 }
  0x28   : > { %s3159_s16 = scalar_select %p79_p9, %s2909_s27, %s115_s7  }
  0x29   : > { %p3164_p8 = por %p238_p5, %p54_p1  ;;  %s4584_s25 = sadd.s32 4294967294, %s2949_s14  }
  0x2a   : > { %4581 = sst [smem:[#allocation22_spill]] %s3159_s16  ;;  %p244_p11 = scmp.eq.s32.totalorder %s4584_s25, 3 }
  0x2b   : > { %s4582_s22 = scalar_select %p3164_p8, 1, 0 }
  0x2c   : > { %p3170_p2 = por %p244_p11, %p243_p6  ;;  %p2482_p10 = scmp.ge.s32.totalorder %s2949_s14, 4 }
  0x2d   : > { %4583 = sst [smem:[#allocation23_spill]] %s4582_s22 }
  0x2e   : > { %s4585_s20 = scalar_select %p3170_p2, 1, 0 }
  0x2f   : > { %272 = sbr.rel (%p2482_p10) target bundleno = 128 (0x80), region = 32 }
  0x30   : > { %4586 = sst [smem:[#allocation24_spill]] %s4585_s20 }
  0x36   : > { %275 = sbr.rel (!%p3108_p3) target bundleno = 72 (0x48), region = 36  ;;  %s277_s7 = sand.u32 (%p3108_p3), 1, %s2929_s9  }
  0x37   : > { %s2484_s28 = sshll.u32 (%p3108_p3), %s2945_s13, 5  ;;  %s2483_s18 = sshll.u32 (%p3108_p3), %s277_s7, 7 }
  0x38   : > { %s281_s16 = sadd.s32 (%p3108_p3), %s2941_s12, %s2484_s28  ;;  %s4587_s0 = sld [smem:[#allocation32_spill]] (%p3108_p3) }
  0x39   : > { %s2485_s24 = sshll.u32 (%p3108_p3), %s281_s16, 3  ;;  %s279_s21 = scalar_lea.vmem (%p3108_p3), [#allocation3], %s2483_s18 }
  0x3e   : > { %s3183_s11 = scalar_lea.vmem %s4587_s0, %s2485_s24 }
  0x3f   : > { %v341_v0 = vld [vmem:[%s3183_s11] sm:$0xff]  ;;  %v343_v1 = vld [vmem:[%s3183_s11 + $0x10] sm:$0xff] }
  0x40   : > { %v345_v2 = vld [vmem:[%s3183_s11 + $0x20] sm:$0xff]  ;;  %342 = vst [vmem:[%s279_s21] sm:$0xff] %v341_v0  ;;  %344 = vst [vmem:[%s279_s21 + $0x8] sm:$0xff] %v343_v1  ;;  %v347_v3 = vld [vmem:[%s3183_s11 + $0x30] sm:$0xff] }
  0x41   : > { %346 = vst [vmem:[%s279_s21 + $0x10] sm:$0xff] %v345_v2  ;;  %v349_v4 = vld [vmem:[%s3183_s11 + $0x40] sm:$0xff]  ;;  %v351_v5 = vld [vmem:[%s3183_s11 + $0x50] sm:$0xff]  ;;  %348 = vst [vmem:[%s279_s21 + $0x18] sm:$0xff] %v347_v3 }
  0x42   : > { %350 = vst [vmem:[%s279_s21 + $0x20] sm:$0xff] %v349_v4  ;;  %352 = vst [vmem:[%s279_s21 + $0x28] sm:$0xff] %v351_v5  ;;  %v353_v6 = vld [vmem:[%s3183_s11 + $0x60] sm:$0xff]  ;;  %v355_v7 = vld [vmem:[%s3183_s11 + $0x70] sm:$0xff] }
  0x43   : > { %v357_v8 = vld [vmem:[%s3183_s11 + $0x80] sm:$0xff]  ;;  %354 = vst [vmem:[%s279_s21 + $0x30] sm:$0xff] %v353_v6  ;;  %356 = vst [vmem:[%s279_s21 + $0x38] sm:$0xff] %v355_v7  ;;  %v359_v9 = vld [vmem:[%s3183_s11 + $0x90] sm:$0xff] }
  0x44   : > { %358 = vst [vmem:[%s279_s21 + $0x40] sm:$0xff] %v357_v8  ;;  %v361_v10 = vld [vmem:[%s3183_s11 + $0xa0] sm:$0xff]  ;;  %v363_v11 = vld [vmem:[%s3183_s11 + $0xb0] sm:$0xff]  ;;  %360 = vst [vmem:[%s279_s21 + $0x48] sm:$0xff] %v359_v9 }
  0x45   : > { %362 = vst [vmem:[%s279_s21 + $0x50] sm:$0xff] %v361_v10  ;;  %364 = vst [vmem:[%s279_s21 + $0x58] sm:$0xff] %v363_v11  ;;  %v365_v12 = vld [vmem:[%s3183_s11 + $0xc0] sm:$0xff]  ;;  %v367_v13 = vld [vmem:[%s3183_s11 + $0xd0] sm:$0xff] }
  0x46   : > { %v369_v14 = vld [vmem:[%s3183_s11 + $0xe0] sm:$0xff]  ;;  %366 = vst [vmem:[%s279_s21 + $0x60] sm:$0xff] %v365_v12  ;;  %368 = vst [vmem:[%s279_s21 + $0x68] sm:$0xff] %v367_v13  ;;  %v371_v15 = vld [vmem:[%s3183_s11 + $0xf0] sm:$0xff] }
  0x47   : > { %370 = vst [vmem:[%s279_s21 + $0x70] sm:$0xff] %v369_v14  ;;  %372 = vst [vmem:[%s279_s21 + $0x78] sm:$0xff] %v371_v15 }
  0x48 PF: > { %s379_s24 = sand.u32 1, %s2921_s30   ;;  %s4549_s16 = sshll.u32 %s2945_s13, 12 }
  0x49   : > { %s2486_s18 = sshll.u32 %s379_s24, 7  ;;  %s4588_s1 = sld [smem:[#allocation33_spill]] }
  0x4a   : > { %s383_s22 = scalar_lea.vmem [#allocation4], %s2486_s18  ;;  %s404_s11 = sand.u32 1, %s2909_s27  }
  0x4b   : > { %s394_s7 = sshll.u32 %s383_s22, 4  ;;  %s3213_s21 = scalar_lea.sflag [#allocation5], %s379_s24  ;;  %s3210_s7 = int_to_ptr.vmem [resolvable:$true] %s394_s7 }
  0x4f   : > { %s3208_s0 = scalar_lea.hbm %s4588_s1, %s4549_s16  ;;  %s2743_s28 = scalar_lea.hbm %s4588_s1, 8192 }
  0x50   : > { %s2739_s12 = scalar_lea.hbm %s3208_s0, 2048  ;;  %p2744_p11 = scmp.lt.u32.totalorder %s3208_s0, %s4588_s1 }
  0x51   : > { %p2740_p1 = scmp.ne.s32.totalorder %s3208_s0, %s2739_s12  ;;  %p2745_p12 = scmp.lt.u32.totalorder %s2743_s28, %s2739_s12 }
  0x52   : > { %p2747_p5 = scmp.lt.u32.totalorder %s2739_s12, %s3208_s0 }
  0x53   : > { %p2741_p3 = pnand %p2740_p1, %p3124_p7  ;;  %p2746_p13 = por %p2745_p12, %p2744_p11 }
  0x55   : > { %p2742_p9 = pneg %p2741_p3  ;;  %p2748_p6 = por %p2747_p5, %p2746_p13 }
  0x57   : > { %p2749_p10 = pnand %p2748_p6, %p2742_p9 }
  0x59   : > { %2752 = shalt.err (!%p2749_p10)
}
  0x5a   : > { %s2753_s24 = scalar_lea.vmem %s3210_s7, 2048  ;;  %s2951_s18 = smov [#allocation4]  }
  0x5b   : > { %p2754_p1 = scmp.ne.s32.totalorder %s3210_s7, %s2753_s24  ;;  %s2757_s22 = sshll.u32 %s2951_s18, 4  ;;  %s2758_s22 = int_to_ptr.vmem [resolvable:$false] %s2757_s22 }
  0x5c   : > { %s2759_s16 = scalar_lea.vmem %s2758_s22, 4096  ;;  %p2760_p8 = scmp.lt.s32.totalorder %s3210_s7, %s2758_s22 }
  0x5d   : > { %p2755_p3 = pnand %p2754_p1, %p3124_p7  ;;  %p2761_p4 = scmp.lt.s32.totalorder %s2759_s16, %s2753_s24 }
  0x5f   : > { %p2756_p2 = pneg %p2755_p3  ;;  %p2762_p11 = por %p2761_p4, %p2760_p8 }
  0x61   : > { %p2763_p12 = pnand %p2762_p11, %p2756_p2 }
  0x63   : > { %2766 = shalt.err (!%p2763_p12)
}
  0x64   : > { %s2952_s12 = smov 256   ;;  %s2953_s28 = smov 128  }
  0x65   : > { %s2954_s25 = smov 8   ;;  %s2490_s24 = sshll.u32 %s404_s11, 7 }
  0x66   : > { %2564 = dma.hbm_to_vmem [thread:$0]  (%p3124_p7), %s3208_s0, 2048, %s3210_s7, %s3213_s21, %s2952_s12, %s2953_s28, %s2954_s25  }
  0x67   : > { %s4589_s18 = sshll.u32 %s2945_s13, 12  ;;  %s408_s16 = scalar_lea.vmem [#allocation7], %s2490_s24 }
  0x68   : > { %s2893_s22 = sadd.s32 128, %s4589_s18  ;;  %s419_s1 = sshll.u32 %s408_s16, 4  ;;  %s3249_s1 = int_to_ptr.vmem [resolvable:$true] %s419_s1 }
  0x69   : > { %s3247_s20 = scalar_lea.hbm %s4535_s2, %s2893_s22  ;;  %s3253_s17 = scalar_lea.sflag [#allocation8], %s404_s11 }
  0x6a   : > { %s2767_s0 = scalar_lea.hbm %s3247_s20, 2048  ;;  %s2771_s30 = scalar_lea.hbm %s4535_s2, 8192 }
  0x6b   : > { %p2768_p7 = scmp.ne.s32.totalorder %s3247_s20, %s2767_s0  ;;  %p2772_p2 = scmp.lt.u32.totalorder %s3247_s20, %s4535_s2 }
  0x6c   : > { %p2773_p9 = scmp.lt.u32.totalorder %s2771_s30, %s2767_s0  ;;  %p2775_p5 = scmp.lt.u32.totalorder %s2767_s0, %s3247_s20 }
  0x6d   : > { %p2769_p4 = pnand %p2768_p7, %p3146_p0 }
  0x6e   : > { %p2774_p13 = por %p2773_p9, %p2772_p2 }
  0x6f   : > { %p2770_p8 = pneg %p2769_p4 }
  0x70   : > { %p2776_p6 = por %p2775_p5, %p2774_p13 }
  0x72   : > { %p2777_p10 = pnand %p2776_p6, %p2770_p8 }
  0x74   : > { %2780 = shalt.err (!%p2777_p10)
}
  0x75   : > { %s2781_s11 = scalar_lea.vmem %s3249_s1, 2048  ;;  %s2955_s18 = smov [#allocation7]  }
  0x76   : > { %p2782_p1 = scmp.ne.s32.totalorder %s3249_s1, %s2781_s11  ;;  %s2785_s22 = sshll.u32 %s2955_s18, 4  ;;  %s2786_s22 = int_to_ptr.vmem [resolvable:$false] %s2785_s22 }
  0x77   : > { %s2787_s16 = scalar_lea.vmem %s2786_s22, 4096  ;;  %p2788_p12 = scmp.lt.s32.totalorder %s3249_s1, %s2786_s22 }
  0x78   : > { %p2783_p3 = pnand %p2782_p1, %p3146_p0  ;;  %p2789_p7 = scmp.lt.s32.totalorder %s2787_s16, %s2781_s11 }
  0x7a   : > { %p2784_p11 = pneg %p2783_p3  ;;  %p2790_p4 = por %p2789_p7, %p2788_p12 }
  0x7c   : > { %p2791_p2 = pnand %p2790_p4, %p2784_p11 }
  0x7e   : > { %2794 = shalt.err (!%p2791_p2)
}
  0x7f   : > { %2565 = dma.hbm_to_vmem [thread:$0]  (%p3146_p0), %s3247_s20, 2048, %s3249_s1, %s3253_s17, %s2952_s12, %s2953_s28, %s2954_s25  }
  0x80 PF: > { %p2493_p8 = scmp.ge.s32.totalorder %s2949_s14, 1  ;;  %p427_p9 = scmp.lt.s32.totalorder %s2949_s14, 5 }
  0x82   : > { %p428_p13 = pnand %p2493_p8, %p427_p9 }
  0x84   : > { %431 = sbr.rel (%p428_p13) target bundleno = 1084 (0x43c), region = 82 }
  0x8b   : > { %s3283_s0 = sand.u32 1, %s2925_s8   ;;  %s440_s19 = sand.u32 1, %s2917_s29  }
  0x8c   : > { %s2494_s7 = sshll.u32 %s3283_s0, 7  ;;  %s2495_s21 = sshll.u32 %s440_s19, 7 }
  0x8d   : > { %s3287_s30 = scalar_lea.vmem [#allocation3], %s2494_s7  ;;  %s441_s9 = scalar_lea.sflag [#allocation5], %s440_s19 }
  0x8e   : > { %s3289_s1 = scalar_lea.vmem [#allocation4], %s2495_s21  ;;  %p4590_p0 = scmp.ne.s32.totalorder %s4577_s23, 0 }
  0x90   : > { %2880 = dma.done.wait (%p4590_p0), %s441_s9, 2048  }
  0x91   : > { %2882 = vsyncadd (%p4590_p0), %s441_s9, 4294965248  ;;  %s449_s20 = sand.u32 1, %s2905_s26   ;;  %p4591_p5 = scmp.ne.s32.totalorder %s4579_s15, 0 }
  0x92   : > { %s2496_s12 = sshll.u32 %s449_s20, 7  ;;  %s450_s28 = scalar_lea.sflag [#allocation8], %s449_s20 }
  0x93   : > { %s3296_s25 = scalar_lea.vmem [#allocation7], %s2496_s12 }
  0x94   : > { %2884 = dma.done.wait (%p4591_p5), %s450_s28, 2048  }
  0x95   : > { %2886 = vsyncadd (%p4591_p5), %s450_s28, 4294965248  ;;  %v520_v16 = vlaneseq  ;;  %v2956_v17 = vmov 1983009808   ;;  %v2957_v21 = vmov 1934713408   ;;  %p896_p6 = scmp.gt.s32.totalorder %s2933_s10, 0 }
  0x96   : > { %v518_v18 = vunpack.c.l.s4 %v2956_v17  ;;  %v582_v22 = vunpack.c.l.s4 %v2957_v21  ;;  %v2715_v25 = vld [vmem:[%s3287_s30] ss:$16 sps:$4 sm:$0xff]   ;;  %v2717_v26 = vld [vmem:[%s3287_s30 + $0x4] ss:$16 sps:$4 sm:$0xff]   ;;  %v2718_v27 = vld [vmem:[%s3287_s30 + $0x8] ss:$16 sps:$4 sm:$0xff]  }
  0x97   : > { %v521_v20 = vshrl.u32 %v520_v16, 7  ;;  %v2720_v28 = vld [vmem:[%s3287_s30 + $0xc] ss:$16 sps:$4 sm:$0xff]   ;;  %v2721_v30 = vld [vmem:[%s3287_s30 + $0x20] ss:$16 sps:$4 sm:$0xff]   ;;  %s2958_s23 = smov 32  }
  0x98   : > { %v519_v19 = vunpack.c.0.s8 %v518_v18  ;;  %v583_v24 = vunpack.c.0.s8 %v582_v22  ;;  %v2723_v31 = vld [vmem:[%s3287_s30 + $0x24] ss:$16 sps:$4 sm:$0xff]   ;;  %v2724_v32 = vld [vmem:[%s3287_s30 + $0x28] ss:$16 sps:$4 sm:$0xff]   ;;  %v2726_v34 = vld [vmem:[%s3287_s30 + $0x2c] ss:$16 sps:$4 sm:$0xff]  }
  0x99   : > { %v2727_v47 = vld [vmem:[%s3287_s30 + $0x40] ss:$16 sps:$4 sm:$0xff]   ;;  %v2729_v48 = vld [vmem:[%s3287_s30 + $0x48] ss:$16 sps:$4 sm:$0xff]   ;;  %v2735_v54 = vld [vmem:[%s3287_s30 + $0x44] ss:$16 sps:$4 sm:$0xff]  }
  0x9a   : > { %v522_v23 = vsub.s32 %v519_v19, %v521_v20  ;;  %v3310_v35 = vsub.s32 %v583_v24, %v521_v20  ;;  %v2731_v49 = vld [vmem:[%s3287_s30 + $0x60] ss:$16 sps:$4 sm:$0xff]   ;;  %v2733_v53 = vld [vmem:[%s3287_s30 + $0x68] ss:$16 sps:$4 sm:$0xff]   ;;  %v2736_v55 = vld [vmem:[%s3287_s30 + $0x4c] ss:$16 sps:$4 sm:$0xff]  }
  0x9b   : > { %v2737_v62 = vld [vmem:[%s3287_s30 + $0x64] ss:$16 sps:$4 sm:$0xff]   ;;  %v2738_v63 = vld [vmem:[%s3287_s30 + $0x6c] ss:$16 sps:$4 sm:$0xff]   ;;  %s3358_s15 = scalar_select %p896_p6, 1, 0 }
  0x9c   : > { %v523_v29 = vrot.slane %v2715_v25, %v522_v23  ;;  %v539_v33 = vrot.slane %v2718_v27, %v522_v23  ;;  %v3312_v36 = vrot.slane %v2717_v26, %v522_v23  ;;  %v3314_v37 = vrot.slane %v2720_v28, %v522_v23  ;;  %s2959_s17 = smov 16   ;;  %p916_p10 = scmp.lt.s32.totalorder %s2933_s10, 1 }
  0x9d   : > { %v555_v38 = vrot.slane %v2721_v30, %v522_v23  ;;  %v571_v39 = vrot.slane %v2724_v32, %v522_v23  ;;  %v3316_v40 = vrot.slane %v2723_v31, %v522_v23  ;;  %v3318_v43 = vrot.slane %v2726_v34, %v522_v23  ;;  %s898_s24 = scvt.s32.f32 %s3358_s15  ;;  %v872_v31 = vld [vmem:[%s3289_s1 + $0x40] sm:$0xff]  ;;  %v873_v32 = vld [vmem:[%s3289_s1 + $0x48] sm:$0xff]  ;;  %s2960_s11 = smov 48  }
  0x9e   : > { %v580_v41 = vcombine.high %v523_v29, %v539_v33  ;;  %v579_v42 = vcombine.low %v523_v29, %v539_v33  ;;  %v595_v44 = vcombine.low %v3312_v36, %v3314_v37  ;;  %v596_v50 = vcombine.high %v3312_v36, %v3314_v37  ;;  %v874_v33 = vld [vmem:[%s3289_s1 + $0x50] sm:$0xff]  ;;  %s3437_s18 = scalar_select %p916_p10, 1, 0 }
  0x9f   : > { %v612_v45 = vcombine.high %v555_v38, %v571_v39  ;;  %v611_v46 = vcombine.low %v555_v38, %v571_v39  ;;  %v627_v57 = vcombine.low %v3316_v40, %v3318_v43  ;;  %v659_v60 = vrot.slane %v2727_v47, %v522_v23  ;;  %v875_v38 = vld [vmem:[%s3289_s1 + $0x58] sm:$0xff]  ;;  %v876_v39 = vld [vmem:[%s3289_s1 + $0x60] sm:$0xff]  ;;  %s2961_s22 = smov 64   ;;  %s2962_s19 = smov 80  }
  0xa0   : > { %v3329_v51 = vrot.slane %v580_v41, %v3310_v35  ;;  %v3332_v52 = vrot.slane %v579_v42, %v3310_v35  ;;  %v3338_v56 = vrot.slane %v595_v44, %v3310_v35  ;;  %v675_v61 = vrot.slane %v2729_v48, %v522_v23  ;;  %v878_v48 = vld [vmem:[%s3289_s1 + $0x70] sm:$0xff]  ;;  %s918_s16 = scvt.s32.f32 %s3437_s18  ;;  %s2963_s7 = smov 96  }
  0xa1   : > { %v3343_v58 = vrot.slane %v612_v45, %v3310_v35  ;;  %v3346_v59 = vrot.slane %v611_v46, %v3310_v35  ;;  %v691_v0 = vrot.slane %v2731_v49, %v522_v23  ;;  %v707_v1 = vrot.slane %v2733_v53, %v522_v23  ;;  %v877_v45 = vld [vmem:[%s3289_s1 + $0x68] sm:$0xff]  ;;  %v879_v49 = vld [vmem:[%s3289_s1 + $0x78] sm:$0xff]  ;;  %s2964_s21 = smov 112   ;;  %s2965_s30 = smov 1  }
  0xa2   : > { %v666_v2 = vrot.slane %v2735_v54, %v522_v23  ;;  %v682_v3 = vrot.slane %v2736_v55, %v522_v23  ;;  %v716_v7 = vcombine.high %v659_v60, %v675_v61  ;;  %v715_v9 = vcombine.low %v659_v60, %v675_v61  ;;  %s2967_s9 = smov 17   ;;  %s2969_s20 = smov 2  }
  0xa3   : > { %v645_v4 = vcombine.low %v3329_v51, %v3343_v58  ;;  %v644_v5 = vcombine.high %v3332_v52, %v3346_v59  ;;  %v643_v6 = vcombine.low %v3332_v52, %v3346_v59  ;;  %v748_v8 = vcombine.high %v691_v0, %v707_v1  ;;  %s2970_s12 = smov 18   ;;  %s2972_s15 = smov 15  }
  0xa4   : > { %v747_v10 = vcombine.low %v691_v0, %v707_v1  ;;  %v646_v11 = vcombine.high %v3329_v51, %v3343_v58  ;;  %v730_v12 = vrot.slane %v716_v7, %v3310_v35  ;;  %v698_v13 = vrot.slane %v2737_v62, %v522_v23  ;;  %v864_v62 = vld [vmem:[%s3289_s1] sm:$0xff]  ;;  %v866_v0 = vld [vmem:[%s3289_s1 + $0x10] sm:$0xff]  ;;  %v867_v1 = vld [vmem:[%s3289_s1 + $0x18] sm:$0xff]  ;;  %s4607_s18 = sld [smem:[#allocation23_spill]] }
  0xa5   : > { %797 = vrot.lane.b32.xlu1 %v645_v4, %s2958_s23  ;;  %789 = vrot.lane.b32.xlu0 %v644_v5, %s2959_s17  ;;  %v714_v14 = vrot.slane %v2738_v63, %v522_v23  ;;  %v762_v15 = vrot.slane %v748_v8, %v3310_v35  ;;  %v3367_v16 = vrot.slane %v715_v9, %v3310_v35  ;;  %v3414_v46 = vstv %s898_s24  ;;  %v865_v63 = vld [vmem:[%s3289_s1 + $0x8] sm:$0xff]  ;;  %s2973_s24 = smov 127  }
  0xa6   : > { %v3370_v17 = vrot.slane %v747_v10, %v3310_v35  ;;  %v731_v18 = vcombine.low %v666_v2, %v682_v3  ;;  %v3373_v20 = vrot.slane %v627_v57, %v3310_v35  ;;  %v732_v21 = vcombine.high %v666_v2, %v682_v3  ;;  %v868_v2 = vld [vmem:[%s3289_s1 + $0x20] sm:$0xff]  ;;  %v869_v8 = vld [vmem:[%s3289_s1 + $0x28] sm:$0xff]  ;;  %v870_v9 = vld [vmem:[%s3289_s1 + $0x30] sm:$0xff] }
  0xa7   : > { %v763_v19 = vcombine.low %v698_v13, %v714_v14  ;;  %v764_v22 = vcombine.high %v698_v13, %v714_v14  ;;  %v781_v23 = vcombine.low %v730_v12, %v762_v15  ;;  %v782_v25 = vcombine.high %v730_v12, %v762_v15 }
  0xa8   : > { %v780_v24 = vcombine.high %v3367_v16, %v3370_v17  ;;  %v3379_v26 = vrot.slane %v731_v18, %v3310_v35  ;;  %v647_v28 = vcombine.low %v3338_v56, %v3373_v20  ;;  %v648_v29 = vcombine.high %v3338_v56, %v3373_v20  ;;  %v890_v56 = vld [vmem:[%s3296_s25 + $0x50] sm:$0xff]  ;;  %v891_v20 = vld [vmem:[%s3296_s25 + $0x58] sm:$0xff] }
  0xa9   : > { %v3382_v27 = vrot.slane %v763_v19, %v3310_v35  ;;  %v3389_v30 = vrot.slane %v732_v21, %v3310_v35  ;;  %799 = vrot.lane.b32.xlu1 %v781_v23, %s2958_s23  ;;  %v3397_v34 = vrot.slane %v764_v22, %v3310_v35  ;;  %v3400_v36 = vrot.slane %v596_v50, %v3310_v35  ;;  %v871_v22 = vld [vmem:[%s3289_s1 + $0x38] sm:$0xff] }
  0xaa   : > { %791 = vrot.lane.b32.xlu0 %v780_v24, %s2959_s17  ;;  %v628_v37 = vcombine.high %v3316_v40, %v3318_v43  ;;  %v779_v44 = vcombine.low %v3367_v16, %v3370_v17  ;;  %v908_v50 = vmul.f32 %v3414_v46, %v872_v31  ;;  %v909_v51 = vmul.f32 %v3414_v46, %v873_v32  ;;  %p4609_p3 = scmp.ne.s32.totalorder %s4607_s18, 0 }
  0xab   : > { %v783_v41 = vcombine.low %v3379_v26, %v3382_v27  ;;  %v784_v42 = vcombine.high %v3379_v26, %v3382_v27  ;;  %v785_v47 = vcombine.low %v3389_v30, %v3397_v34  ;;  %v786_v43 = vcombine.high %v3389_v30, %v3397_v34 }
  0xac   : > { %v3419_v40 = vrot.slane %v628_v37, %v3310_v35  ;;  %v910_v53 = vmul.f32 %v3414_v46, %v874_v33  ;;  %v911_v54 = vmul.f32 %v3414_v46, %v875_v38  ;;  %v912_v55 = vmul.f32 %v3414_v46, %v876_v39  ;;  %v888_v38 = vld [vmem:[%s3296_s25 + $0x40] sm:$0xff]  ;;  %v889_v39 = vld [vmem:[%s3296_s25 + $0x48] sm:$0xff] }
  0xad   : > { %807 = vrot.lane.b32.xlu1 %v782_v25, %s2960_s11  ;;  %v913_v58 = vmul.f32 %v3414_v46, %v877_v45  ;;  %v914_v60 = vmul.f32 %v3414_v46, %v878_v48  ;;  %v915_v61 = vmul.f32 %v3414_v46, %v879_v49  ;;  %vm957_vm0 = vcmask 1041409  }
  0xae   : > { %805 = vrot.lane.b32.xlu0 %v646_v11, %s2960_s11  ;;  %v649_v35 = vcombine.low %v3400_v36, %v3419_v40  ;;  %v650_v57 = vcombine.high %v3400_v36, %v3419_v40  ;;  %vm960_vm1 = vcmask 1042434   ;;  %vm963_vm2 = vcmask 1043459   ;;  %s2974_s11 = smov 113  }
  0xaf   : > { %vm966_vm3 = vcmask 1044484   ;;  %vm969_vm4 = vcmask 1045509   ;;  %vm972_vm5 = vcmask 1046534   ;;  %v976_v3 = vrot.slane %v908_v50, 7 }
  0xb0   : > { %v977_v4 = vrot.slane %v909_v51, 6  ;;  %v979_v5 = vrot.slane %v910_v53, 5  ;;  %v981_v7 = vrot.slane %v911_v54, 4  ;;  %v983_v10 = vrot.slane %v912_v55, 3  ;;  %v892_v51 = vld [vmem:[%s3296_s25 + $0x60] sm:$0xff]  ;;  %v893_v53 = vld [vmem:[%s3296_s25 + $0x68] sm:$0xff] }
  0xb1   : > { %815 = vrot.lane.b32.xlu1 %v783_v41, %s2961_s22  ;;  %v985_v11 = vrot.slane %v913_v58, 2  ;;  %v987_v12 = vrot.slane %v914_v60, 1  ;;  %v900_v13 = vmul.f32 %v3414_v46, %v864_v62  ;;  %v901_v15 = vmul.f32 %v3414_v46, %v865_v63  ;;  %v894_v54 = vld [vmem:[%s3296_s25 + $0x70] sm:$0xff] }
  0xb2   : > { %813 = vrot.lane.b32.xlu0 %v647_v28, %s2961_s22  ;;  %v978_v14 = vsel %vm957_vm0, %v977_v4, %v976_v3  ;;  %v902_v18 = vmul.f32 %v3414_v46, %v866_v0  ;;  %v903_v19 = vmul.f32 %v3414_v46, %v867_v1  ;;  %v904_v23 = vmul.f32 %v3414_v46, %v868_v2  ;;  %s2971_s22 = smov 34  }
  0xb3   : > { %v980_v21 = vsel %vm960_vm1, %v979_v5, %v978_v14  ;;  %v905_v24 = vmul.f32 %v3414_v46, %v869_v8  ;;  %v906_v25 = vmul.f32 %v3414_v46, %v870_v9  ;;  %vm974_vm6 = vcmask 1047559  }
  0xb4   : > { %v982_v26 = vsel %vm963_vm2, %v981_v7, %v980_v21  ;;  %v955_v27 = vrot.slane %v900_v13, 7  ;;  %v956_v28 = vrot.slane %v901_v15, 6  ;;  %v959_v32 = vrot.slane %v902_v18, 5  ;;  %v880_v7 = vld [vmem:[%s3296_s25] sm:$0xff]  ;;  %v885_v21 = vld [vmem:[%s3296_s25 + $0x28] sm:$0xff] }
  0xb5   : > { %823 = vrot.lane.b32.xlu1 %v784_v42, %s2962_s19  ;;  %v984_v31 = vsel %vm966_vm3, %v983_v10, %v982_v26  ;;  %v962_v33 = vrot.slane %v903_v19, 4  ;;  %v965_v37 = vrot.slane %v904_v23, 3  ;;  %v907_v45 = vmul.f32 %v3414_v46, %v871_v22  ;;  %v895_v46 = vld [vmem:[%s3296_s25 + $0x78] sm:$0xff]  ;;  %v884_v19 = vld [vmem:[%s3296_s25 + $0x20] sm:$0xff]  ;;  %v886_v22 = vld [vmem:[%s3296_s25 + $0x30] sm:$0xff] }
  0xb6   : > { %821 = vrot.lane.b32.xlu0 %v648_v29, %s2962_s19  ;;  %v986_v41 = vsel %vm969_vm4, %v985_v11, %v984_v31  ;;  %v958_v42 = vsel %vm957_vm0, %v956_v28, %v955_v27  ;;  %v968_v48 = vrot.slane %v905_v24, 2  ;;  %v971_v50 = vrot.slane %v906_v25, 1  ;;  %v881_v11 = vld [vmem:[%s3296_s25 + $0x8] sm:$0xff]  ;;  %v887_v26 = vld [vmem:[%s3296_s25 + $0x38] sm:$0xff] }
  0xb7   : > { %v988_v29 = vsel %vm972_vm5, %v987_v12, %v986_v41  ;;  %v961_v49 = vsel %vm960_vm1, %v959_v32, %v958_v42  ;;  %v919_v55 = vstv %s918_s16  ;;  %v883_v12 = vld [vmem:[%s3296_s25 + $0x18] sm:$0xff]  ;;  %vm936_vm7 = vcmask 7168  }
  0xb8   : > { %v989_v58 = vsel %vm974_vm6, %v915_v61, %v988_v29  ;;  %v964_v60 = vsel %vm963_vm2, %v962_v33, %v961_v49  ;;  %v928_v62 = vmul.f32 %v919_v55, %v888_v38  ;;  %v929_v63 = vmul.f32 %v919_v55, %v889_v39 }
  0xb9   : > { %831 = vrot.lane.b32.xlu1 %v785_v47, %s2963_s7  ;;  %v967_v0 = vsel %vm966_vm3, %v965_v37, %v964_v60  ;;  %v930_v61 = vmul.f32 %v919_v55, %v890_v56  ;;  %v931_v1 = vmul.f32 %v919_v55, %v891_v20  ;;  %v932_v3 = vmul.f32 %v919_v55, %v892_v51 }
  0xba   : > { %829 = vrot.lane.b32.xlu0 %v649_v35, %s2963_s7  ;;  %v970_v2 = vsel %vm969_vm4, %v968_v48, %v967_v0  ;;  %v933_v4 = vmul.f32 %v919_v55, %v893_v53  ;;  %v934_v5 = vmul.f32 %v919_v55, %v894_v54  ;;  %v935_v8 = vmul.f32 %v919_v55, %v895_v46  ;;  %v882_v35 = vld [vmem:[%s3296_s25 + $0x10] sm:$0xff]  ;;  %s2976_s25 = smov [#allocation9]  }
  0xbb   : > { %v973_v47 = vsel %vm972_vm5, %v971_v50, %v970_v2  ;;  %v1043_v9 = vrot.slane %v929_v63, 7  ;;  %v1045_v10 = vrot.slane %v930_v61, 6  ;;  %v1047_v14 = vrot.slane %v931_v1, 5 }
  0xbc   : > { %v975_v13 = vsel %vm974_vm6, %v907_v45, %v973_v47  ;;  %v1049_v15 = vrot.slane %v932_v3, 4  ;;  %v1051_v18 = vrot.slane %v933_v4, 3  ;;  %v1053_v24 = vrot.slane %v934_v5, 2 }
  0xbd   : > { %839 = vrot.lane.b32.xlu1 %v786_v43, %s2964_s21  ;;  %v1044_v23 = vsel %vm957_vm0, %v1043_v9, %v928_v62  ;;  %v1055_v25 = vrot.slane %v935_v8, 1  ;;  %v920_v27 = vmul.f32 %v919_v55, %v880_v7  ;;  %v921_v31 = vmul.f32 %v919_v55, %v881_v11 }
  0xbe   : > { %837 = vrot.lane.b32.xlu0 %v650_v57, %s2964_s21  ;;  %v1046_v28 = vsel %vm960_vm1, %v1045_v10, %v1044_v23  ;;  %v922_v32 = vmul.f32 %v919_v55, %v882_v35  ;;  %v923_v33 = vmul.f32 %v919_v55, %v883_v12  ;;  %v924_v30 = vmul.f32 %v919_v55, %v884_v19 }
  0xbf   : > { %v1048_v37 = vsel %vm963_vm2, %v1047_v14, %v1046_v28  ;;  %v925_v34 = vmul.f32 %v919_v55, %v885_v21  ;;  %v926_v43 = vmul.f32 %v919_v55, %v886_v22  ;;  %v927_v36 = vmul.f32 %v919_v55, %v887_v26  ;;  %v2504_v21 = vld [vmem:[%s4538_s5 + $0xc8] sm:$0xff]  ;;  %v2503_v22 = vld [vmem:[%s4538_s5 + $0xc0] sm:$0xff]  ;;  %v2506_v26 = vld [vmem:[%s4538_s5 + $0xd8] sm:$0xff] }
  0xc0   : > { %v1050_v38 = vsel %vm966_vm3, %v1049_v15, %v1048_v37  ;;  %v1029_v40 = vrot.slane %v921_v31, 7  ;;  %v1031_v57 = vrot.slane %v922_v32, 6  ;;  %v1033_v41 = vrot.slane %v923_v33, 5  ;;  %v2508_v28 = vld [vmem:[%s4538_s5 + $0xe8] sm:$0xff]  ;;  %v1259_v31 = vld [vmem:[%s4538_s5] sm:$0xff]  ;;  %v1261_v33 = vld [vmem:[%s4538_s5 + $0x10] sm:$0xff] }
  0xc1   : > { %992 = vrot.lane.b32.xlu1 %v989_v58, %s2965_s30  ;;  %v1052_v39 = vsel %vm969_vm4, %v1051_v18, %v1050_v38  ;;  %v1035_v45 = vrot.slane %v924_v30, 4  ;;  %v1037_v56 = vrot.slane %v925_v34, 3  ;;  %v1039_v49 = vrot.slane %v926_v43, 2  ;;  %v1260_v32 = vld [vmem:[%s4538_s5 + $0x8] sm:$0xff]  ;;  %v1262_v37 = vld [vmem:[%s4538_s5 + $0x18] sm:$0xff]  ;;  %v1263_v30 = vld [vmem:[%s4538_s5 + $0x20] sm:$0xff] }
  0xc2   : > { %990 = vrot.lane.b32.xlu0 %v975_v13, %s2965_s30  ;;  %v1054_v42 = vsel %vm972_vm5, %v1053_v24, %v1052_v39  ;;  %v1030_v48 = vsel %vm957_vm0, %v1029_v40, %v920_v27  ;;  %v1041_v51 = vrot.slane %v927_v36, 1  ;;  %v2966_v53 = vmov 0   ;;  %v2507_v27 = vld [vmem:[%s4538_s5 + $0xe0] sm:$0xff]  ;;  %v1264_v34 = vld [vmem:[%s4538_s5 + $0x28] sm:$0xff]  ;;  %v2510_v43 = vld [vmem:[%s4538_s5 + $0x30] sm:$0xff] }
  0xc3   : > { %v1056_v20 = vsel %vm974_vm6, %v1055_v25, %v1054_v42  ;;  %v1032_v29 = vsel %vm960_vm1, %v1031_v57, %v1030_v48  ;;  %2714 = vset.pattern.permute.xlu1 %v2966_v53  ;;  %2713 = vset.pattern.permute.xlu0 %v2966_v53  ;;  %v2968_v63 = vmov 0.0   ;;  %vm843_vm8 = vcmask 130048   ;;  %v2505_v25 = vld [vmem:[%s4538_s5 + $0xd0] sm:$0xff]  ;;  %v2511_v38 = vld [vmem:[%s4538_s5 + $0x38] sm:$0xff]  ;;  %v2512_v36 = vld [vmem:[%s4538_s5 + $0x40] sm:$0xff] }
  0xc4   : > { %v1034_v50 = vsel %vm963_vm2, %v1033_v41, %v1032_v29  ;;  %938 = vst.msk [vmem:[#allocation2 + $0x10] sm:$0xff] %vm936_vm7, %v2968_v63  ;;  %937 = vst.msk [vmem:[#allocation2] sm:$0xff] %vm936_vm7, %v2968_v63  ;;  %1161 = vmatprep.mubr.f32.mxu0 %v2968_v63  ;;  %1179 = vmatprep.mubr.f32.mxu1 %v2968_v63  ;;  %vm846_vm9 = vcmask 261120   ;;  %vm849_vm10 = vcmask 392192   ;;  %vm852_vm11 = vcmask 523264   ;;  %v2513_v40 = vld [vmem:[%s4538_s5 + $0x48] sm:$0xff] }
  0xc5   : > { %1059 = vrot.lane.b32.xlu1 %v1056_v20, %s2967_s9  ;;  %v1036_v54 = vsel %vm966_vm3, %v1035_v45, %v1034_v50  ;;  %vm855_vm12 = vcmask 654336   ;;  %vm858_vm13 = vcmask 785408   ;;  %vm861_vm14 = vcmask 916480   ;;  %v2514_v57 = vld [vmem:[%s4538_s5 + $0x50] sm:$0xff]  ;;  %v2515_v39 = vld [vmem:[%s4538_s5 + $0x58] sm:$0xff]  ;;  %v2517_v45 = vld [vmem:[%s4538_s5 + $0x60] sm:$0xff] }
  0xc6   : > { %v1038_v55 = vsel %vm969_vm4, %v1037_v56, %v1036_v54  ;;  %vm996_vm15 = vcmask 138248   ;;  %v3598_v41 = vld [vmem:[%s4536_s3 + $0x1] ss:$0 sm:$0xff]  ;;  %v2518_v42 = vld [vmem:[%s4538_s5 + $0x68] sm:$0xff]  ;;  %v2519_v48 = vld [vmem:[%s4538_s5 + $0x70] sm:$0xff]  ;;  %vm1007_vm0 = vcmask 1047688  }
  0xc7   : > { %v1040_v58 = vsel %vm972_vm5, %v1039_v49, %v1038_v55  ;;  %v2520_v56 = vld [vmem:[%s4538_s5 + $0x78] sm:$0xff]  ;;  %v2521_v20 = vld [vmem:[%s4538_s5 + $0x80] sm:$0xff]  ;;  %v2522_v29 = vld [vmem:[%s4538_s5 + $0x88] sm:$0xff]  ;;  %vm1009_vm1 = vcmask 138240   ;;  %vm1063_vm2 = vcmask 269448   ;;  %vm1066_vm3 = vcmask 277768  }
  0xc8   : > { %v1042_v60 = vsel %vm974_vm6, %v1041_v51, %v1040_v58  ;;  %v3622_v49 = vld [vmem:[%s4536_s3] ss:$0 sm:$0xff]  ;;  %v2523_v50 = vld [vmem:[%s4538_s5 + $0x90] sm:$0xff]  ;;  %v2524_v51 = vld [vmem:[%s4538_s5 + $0x98] sm:$0xff]  ;;  %vm1819_vm4 = vcmask 1039360   ;;  %vm1557_vm5 = vcmask 121856  }
  0xc9   : > { %1057 = vrot.lane.b32.xlu0 %v1042_v60, %s2967_s9  ;;  %v2525_v53 = vld [vmem:[%s4538_s5 + $0xa0] sm:$0xff]  ;;  %v2526_v54 = vld [vmem:[%s4538_s5 + $0xa8] sm:$0xff]  ;;  %v2527_v55 = vld [vmem:[%s4538_s5 + $0xb0] sm:$0xff]  ;;  %vm1950_vm6 = vcmask 924672  }
  0xca   : > { %v2528_v58 = vld [vmem:[%s4538_s5 + $0xb8] sm:$0xff]  ;;  %v2529_v60 = vld [vmem:[%s4538_s5 + $0xf0] sm:$0xff] }
 0x117   : > { %v798_v46 = vpop.permute.xlu1 %797  ;;  %v790_v62 = vpop.permute.xlu0 %789 }
 0x118   : > { %v844_v47 = vsel %vm843_vm8, %v643_v6, %v790_v62  ;;  %v2531_v62 = vld [vmem:[%s4538_s5 + $0x100] sm:$0xff] }
 0x119   : > { %v847_v10 = vsel %vm846_vm9, %v844_v47, %v798_v46  ;;  %v2530_v46 = vld [vmem:[%s4538_s5 + $0xf8] sm:$0xff]  ;;  %v2540_v47 = vld [vmem:[%s4538_s5 + $0x148] sm:$0xff] }
 0x11b   : > { %v800_v0 = vpop.permute.xlu1 %799 }
 0x11c   : > { %v792_v61 = vpop.permute.xlu0 %791 }
 0x11d   : > { %v845_v8 = vsel %vm843_vm8, %v779_v44, %v792_v61  ;;  %v2533_v61 = vld [vmem:[%s4538_s5 + $0x110] sm:$0xff] }
 0x11e   : > { %v848_v9 = vsel %vm846_vm9, %v845_v8, %v800_v0  ;;  %v2532_v0 = vld [vmem:[%s4538_s5 + $0x108] sm:$0xff]  ;;  %v2541_v8 = vld [vmem:[%s4538_s5 + $0x150] sm:$0xff]  ;;  %vm2196_vm9 = vcmask 908288  }
 0x11f   : > { %v808_v1 = vpop.permute.xlu1 %807 }
 0x120   : > { %v806_v2 = vpop.permute.xlu0 %805  ;;  %v851_v12 = vsel %vm849_vm10, %v848_v9, %v808_v1  ;;  %v2534_v1 = vld [vmem:[%s4538_s5 + $0x118] sm:$0xff] }
 0x121   : > { %v850_v13 = vsel %vm849_vm10, %v847_v10, %v806_v2  ;;  %v2535_v2 = vld [vmem:[%s4538_s5 + $0x120] sm:$0xff]  ;;  %v2542_v9 = vld [vmem:[%s4538_s5 + $0x158] sm:$0xff] }
 0x122   : > { %v2543_v10 = vld [vmem:[%s4538_s5 + $0x160] sm:$0xff] }
 0x123   : > { %v816_v3 = vpop.permute.xlu1 %815 }
 0x124   : > { %v814_v4 = vpop.permute.xlu0 %813  ;;  %v854_v14 = vsel %vm852_vm11, %v851_v12, %v816_v3  ;;  %v2536_v3 = vld [vmem:[%s4538_s5 + $0x128] sm:$0xff]  ;;  %v2546_v12 = vld [vmem:[%s4538_s5 + $0x178] sm:$0xff] }
 0x125   : > { %v853_v52 = vsel %vm852_vm11, %v850_v13, %v814_v4  ;;  %v2537_v4 = vld [vmem:[%s4538_s5 + $0x130] sm:$0xff]  ;;  %v2547_v13 = vld [vmem:[%s4538_s5 + $0x180] sm:$0xff] }
 0x127   : > { %v824_v5 = vpop.permute.xlu1 %823 }
 0x128   : > { %v822_v7 = vpop.permute.xlu0 %821  ;;  %v857_v59 = vsel %vm855_vm12, %v854_v14, %v824_v5  ;;  %v2538_v5 = vld [vmem:[%s4538_s5 + $0x138] sm:$0xff]  ;;  %v2548_v14 = vld [vmem:[%s4538_s5 + $0x188] sm:$0xff] }
 0x129   : > { %v856_v6 = vsel %vm855_vm12, %v853_v52, %v822_v7  ;;  %v2539_v7 = vld [vmem:[%s4538_s5 + $0x140] sm:$0xff] }
 0x12b   : > { %v832_v11 = vpop.permute.xlu1 %831 }
 0x12c   : > { %v830_v35 = vpop.permute.xlu0 %829  ;;  %v860_v15 = vsel %vm858_vm13, %v857_v59, %v832_v11  ;;  %v2544_v11 = vld [vmem:[%s4538_s5 + $0x168] sm:$0xff] }
 0x12d   : > { %v859_v16 = vsel %vm858_vm13, %v856_v6, %v830_v35  ;;  %v2545_v35 = vld [vmem:[%s4538_s5 + $0x170] sm:$0xff] }
 0x12e   : > { %v2549_v6 = vld [vmem:[%s4538_s5 + $0x190] sm:$0xff] }
 0x12f   : > { %v840_v17 = vpop.permute.xlu1 %839 }
 0x130   : > { %v838_v44 = vpop.permute.xlu0 %837  ;;  %v863_v18 = vsel %vm861_vm14, %v860_v15, %v840_v17  ;;  %v2550_v15 = vld [vmem:[%s4538_s5 + $0x198] sm:$0xff]  ;;  %v2552_v17 = vld [vmem:[%s4538_s5 + $0x1a8] sm:$0xff] }
 0x131   : > { %v862_v19 = vsel %vm861_vm14, %v859_v16, %v838_v44  ;;  %1003 = vrot.lane.b32.xlu1 %v863_v18, %s2967_s9  ;;  %v2551_v16 = vld [vmem:[%s4538_s5 + $0x1a0] sm:$0xff] }
 0x132   : > { %1001 = vrot.lane.b32.xlu0 %v862_v19, %s2967_s9  ;;  %v2227_v19 = vld [vmem:[%s4539_s6] sm:$0xff] }
 0x133   : > { %v993_v23 = vpop.permute.xlu1 %992 }
 0x134   : > { %v991_v24 = vpop.permute.xlu0 %990  ;;  %998 = vst.msk [vmem:[#allocation2 + $0x10] sm:$0xff] %vm996_vm15, %v993_v23 }
 0x135   : > { %997 = vst.msk [vmem:[#allocation2] sm:$0xff] %vm996_vm15, %v991_v24  ;;  %1214 = vperm.xlu1 %2714, %v2504_v21   ;;  %v2228_v21 = vld [vmem:[%s4539_s6 + $0x8] sm:$0xff] }
 0x136   : > { %1209 = vperm.xlu0 %2713, %v2503_v22   ;;  %v2229_v22 = vld [vmem:[%s4539_s6 + $0x10] sm:$0xff] }
 0x137   : > { %v1060_v52 = vpop.permute.xlu1 %1059 }
 0x139   : > { %1219 = vperm.xlu1 %2714, %v2505_v25  }
 0x13a   : > { %1224 = vperm.xlu0 %2713, %v2506_v26  }
 0x13b   : > { %v1058_v59 = vpop.permute.xlu0 %1057 }
 0x13d   : > { %1229 = vperm.xlu1 %2714, %v2507_v27  }
 0x13e   : > { %1234 = vperm.xlu0 %2713, %v2508_v28   ;;  %v2230_v28 = vld [vmem:[%s4539_s6 + $0x18] sm:$0xff] }
 0x141   : > { %1267 = vperm.xlu1 %2714, %v1259_v31   ;;  %v2231_v31 = vld [vmem:[%s4539_s6 + $0x20] sm:$0xff] }
 0x142   : > { %1272 = vperm.xlu0 %2713, %v1260_v32  }
 0x145   : > { %1277 = vperm.xlu1 %2714, %v1261_v33   ;;  %v1069_v33 = vld [vmem:[%s4537_s4] sm:$0xff] }
 0x146   : > { %1282 = vperm.xlu0 %2713, %v1262_v37   ;;  %v1072_v37 = vld [vmem:[%s4537_s4 + $0x18] sm:$0xff] }
 0x149   : > { %1287 = vperm.xlu1 %2714, %v1263_v30   ;;  %v2232_v30 = vld [vmem:[%s4539_s6 + $0x28] sm:$0xff] }
 0x14a   : > { %1292 = vperm.xlu0 %2713, %v1264_v34   ;;  %v1070_v34 = vld [vmem:[%s4537_s4 + $0x8] sm:$0xff] }
 0x14d   : > { %1346 = vperm.xlu1 %2714, %v2510_v43   ;;  %v1073_v43 = vld [vmem:[%s4537_s4 + $0x20] sm:$0xff] }
 0x14e   : > { %1351 = vperm.xlu0 %2713, %v2511_v38   ;;  %v1071_v38 = vld [vmem:[%s4537_s4 + $0x10] sm:$0xff] }
 0x151   : > { %1356 = vperm.xlu1 %2714, %v2512_v36   ;;  %v1074_v36 = vld [vmem:[%s4537_s4 + $0x28] sm:$0xff] }
 0x152   : > { %1361 = vperm.xlu0 %2713, %v2513_v40  }
 0x155   : > { %1366 = vperm.xlu1 %2714, %v2514_v57  }
 0x156   : > { %1371 = vperm.xlu0 %2713, %v2515_v39  }
 0x159   : > { %1457 = vrot.lane.b32.xlu1 %v3598_v41, %s2969_s20  ;;  %s4608_s20 = sld [smem:[#allocation34_spill]] }
 0x15a   : > { %1481 = vperm.xlu0 %2713, %v2517_v45  }
 0x15d   : > { %1486 = vperm.xlu1 %2714, %v2518_v42  }
 0x15e   : > { %1491 = vperm.xlu0 %2713, %v2519_v48  }
 0x161   : > { %1496 = vperm.xlu1 %2714, %v2520_v56  }
 0x162   : > { %1501 = vperm.xlu0 %2713, %v2521_v20  }
 0x165   : > { %1506 = vperm.xlu1 %2714, %v2522_v29  }
 0x166   : > { %1589 = vrot.lane.b32.xlu0 %v3622_v49, %s2959_s17 }
 0x169   : > { %1613 = vperm.xlu1 %2714, %v2523_v50  }
 0x16a   : > { %1618 = vperm.xlu0 %2713, %v2524_v51  }
 0x16d   : > { %1623 = vperm.xlu1 %2714, %v2525_v53  }
 0x16e   : > { %1628 = vperm.xlu0 %2713, %v2526_v54  }
 0x171   : > { %1633 = vperm.xlu1 %2714, %v2527_v55  }
 0x172   : > { %1638 = vperm.xlu0 %2713, %v2528_v58  }
 0x175   : > { %1719 = vrot.lane.b32.xlu1 %v3598_v41, %s2970_s12 }
 0x176   : > { %1743 = vperm.xlu0 %2713, %v2529_v60  }
 0x179   : > { %1748 = vperm.xlu1 %2714, %v2530_v46  }
 0x17a   : > { %1753 = vperm.xlu0 %2713, %v2531_v62  }
 0x17d   : > { %1758 = vperm.xlu1 %2714, %v2532_v0  }
 0x17e   : > { %1763 = vperm.xlu0 %2713, %v2533_v61  }
 0x181   : > { %1768 = vperm.xlu1 %2714, %v2534_v1  }
 0x182   : > { %1850 = vrot.lane.b32.xlu0 %v3622_v49, %s2958_s23  ;;  %s2975_s23 = smov 111  }
 0x185   : > { %1874 = vperm.xlu1 %2714, %v2535_v2  }
 0x186   : > { %1879 = vperm.xlu0 %2713, %v2536_v3  }
 0x189   : > { %1884 = vperm.xlu1 %2714, %v2537_v4  }
 0x18a   : > { %1889 = vperm.xlu0 %2713, %v2538_v5  }
 0x18d   : > { %1894 = vperm.xlu1 %2714, %v2539_v7  }
 0x18e   : > { %1899 = vperm.xlu0 %2713, %v2540_v47  }
 0x191   : > { %1990 = vperm.xlu1 %2714, %v2541_v8  }
 0x192   : > { %1995 = vperm.xlu0 %2713, %v2542_v9  }
 0x195   : > { %2000 = vperm.xlu1 %2714, %v2543_v10  }
 0x196   : > { %2005 = vperm.xlu0 %2713, %v2544_v11  }
 0x199   : > { %2010 = vperm.xlu1 %2714, %v2545_v35  }
 0x19a   : > { %2015 = vperm.xlu0 %2713, %v2546_v12  }
 0x19d   : > { %2120 = vperm.xlu1 %2714, %v2547_v13  }
 0x19e   : > { %2125 = vperm.xlu0 %2713, %v2548_v14  }
 0x1a1   : > { %2130 = vperm.xlu1 %2714, %v2549_v6  }
 0x1a2   : > { %2135 = vperm.xlu0 %2713, %v2550_v15  }
 0x1a3   : > { %v1004_v44 = vpop.permute.xlu1 %1003 }
 0x1a4   : > { %v1002_v18 = vpop.permute.xlu0 %1001  ;;  %1011 = vst.msk [vmem:[#allocation2 + $0x10] sm:$0xff] %vm1007_vm0, %v1004_v44 }
 0x1a5   : > { %1012 = vst.msk [vmem:[#allocation2 + $0x18] sm:$0xff] %vm1009_vm1, %v1004_v44  ;;  %1010 = vst.msk [vmem:[#allocation2 + $0x8] sm:$0xff] %vm1009_vm1, %v1002_v18  ;;  %2140 = vperm.xlu1 %2714, %v2551_v16  }
 0x1a6   : > { %1008 = vst.msk [vmem:[#allocation2] sm:$0xff] %vm1007_vm0, %v1002_v18  ;;  %2145 = vperm.xlu0 %2713, %v2552_v17  }
 0x1a7   : > { %1065 = vst.msk [vmem:[#allocation2 + $0x18] sm:$0xff] %vm1063_vm2, %v1060_v52  ;;  %1064 = vst.msk [vmem:[#allocation2 + $0x8] sm:$0xff] %vm1063_vm2, %v1058_v59 }
 0x1a8   : > { %1068 = vst.msk [vmem:[#allocation2 + $0x18] sm:$0xff] %vm1066_vm3, %v2968_v63  ;;  %1067 = vst.msk [vmem:[#allocation2 + $0x8] sm:$0xff] %vm1066_vm3, %v2968_v63 }
 0x1a9   : > { %2096 = vrot.lane.b32.xlu1 %v3598_v41, %s2971_s22 }
 0x1aa   : > { %2235 = vperm.xlu0 %2713, %v2227_v19  }
 0x1ab   : > { %v1077_v26 = vld [vmem:[#allocation2 + $0x10] sm:$0xff] }
 0x1ad   : > { %v1075_v23 = vld [vmem:[#allocation2] sm:$0xff]  ;;  %2240 = vperm.xlu1 %2714, %v2228_v21  }
 0x1ae   : > { %2245 = vperm.xlu0 %2713, %v2229_v22   ;;  %v2558_v32 = vpack.c.bf16 %v1077_v26, %v1075_v23 }
 0x1af   : > { %v1076_v24 = vld [vmem:[#allocation2 + $0x8] sm:$0xff]  ;;  %v1078_v25 = vld [vmem:[#allocation2 + $0x18] sm:$0xff] }
 0x1b0   : > { %v2556_v27 = vpack.c.bf16 %v1078_v25, %v1076_v24 }
 0x1b1   : > { %2250 = vperm.xlu1 %2714, %v2230_v28  }
 0x1b2   : > { %2557 = vmatprep.subr.bf16.mxu0 %v2556_v27  ;;  %2560 = vmatprep.subr.bf16.mxu1 %v2556_v27 }
 0x1b3   : > { %2255 = vperm.xlu0 %2713, %v2231_v31   ;;  %2559 = vmatpush1.bf16.msra.mxu0 %v2558_v32 }
 0x1b4   : > { %2561 = vmatpush1.bf16.msra.mxu1 %v2558_v32  ;;  %v3770_v57 = vpop.permute.xlu1 %1214 }
 0x1b5   : > { %2260 = vperm.xlu1 %2714, %v2232_v30   ;;  %v3768_v40 = vpop.permute.xlu0 %1209  ;;  %4592 = vst [vmem:[#allocation25_spill] sm:$0xff] %v3770_v57 }
 0x1b6   : > { %2497 = vmatmul.mubr.msk.f32.vlgmr.msra.gmra.mrb[0].mxu0 %vm843_vm8, %v1069_v33 }
 0x1b7   : > { %2500 = vmatmul.mubr.msk.f32.vlgmr.msra.gmra.mrb[0].mxu1 %vm843_vm8, %v1072_v37  ;;  %1167 = vmatprep.mubr.f32.mxu0 %v2968_v63 }
 0x1b8   : > { %1185 = vmatprep.mubr.f32.mxu1 %v2968_v63  ;;  %v3774_v41 = vpop.permute.xlu1 %1219 }
 0x1b9   : > { %v3772_v39 = vpop.permute.xlu0 %1224  ;;  %4594 = vst [vmem:[#allocation27_spill] sm:$0xff] %v3774_v41 }
 0x1ba   : > { %2498 = vmatmul.mubr.msk.f32.gmra.mrb[2].mxu0 %vm843_vm8, %v1070_v34  ;;  %4593 = vst [vmem:[#allocation26_spill] sm:$0xff] %v3772_v39 }
 0x1bb   : > { %2501 = vmatmul.mubr.msk.f32.gmra.mrb[2].mxu1 %vm843_vm8, %v1073_v43  ;;  %1173 = vmatprep.mubr.f32.mxu0 %v2968_v63 }
 0x1bc   : > { %1191 = vmatprep.mubr.f32.mxu1 %v2968_v63  ;;  %v3778_v45 = vpop.permute.xlu1 %1229 }
 0x1bd   : > { %v3776_v63 = vpop.permute.xlu0 %1234  ;;  %4596 = vst [vmem:[#allocation29_spill] sm:$0xff] %v3778_v45 }
 0x1be   : > { %2499 = vmatmul.mubr.msk.f32.gmra.mrb[4].mxu0 %vm843_vm8, %v1071_v38  ;;  %4595 = vst [vmem:[#allocation28_spill] sm:$0xff] %v3776_v63 }
 0x1bf   : > { %2502 = vmatmul.mubr.msk.f32.gmra.mrb[4].mxu1 %vm843_vm8, %v1074_v36 }
 0x1c0   : > { %v3782_v48 = vpop.permute.xlu1 %1267 }
 0x1c1   : > { %v3780_v42 = vpop.permute.xlu0 %1272 }
 0x1c4   : > { %v3786_v20 = vpop.permute.xlu1 %1277 }
 0x1c5   : > { %v3784_v56 = vpop.permute.xlu0 %1282 }
 0x1c8   : > { %v3790_v50 = vpop.permute.xlu1 %1287 }
 0x1c9   : > { %v3788_v29 = vpop.permute.xlu0 %1292 }
 0x1cc   : > { %v1347_v53 = vpop.permute.xlu1 %1346 }
 0x1cd   : > { %v3792_v51 = vpop.permute.xlu0 %1351 }
 0x1d0   : > { %v3794_v55 = vpop.permute.xlu1 %1356 }
 0x1d1   : > { %v1362_v54 = vpop.permute.xlu0 %1361 }
 0x1d4   : > { %v3798_v60 = vpop.permute.xlu1 %1366 }
 0x1d5   : > { %v3796_v58 = vpop.permute.xlu0 %1371 }
 0x1d8   : > { %v3802_v62 = vpop.permute.xlu1 %1457 }
 0x1d9   : > { %v3800_v46 = vpop.permute.xlu0 %1481 }
 0x1dc   : > { %v3806_v61 = vpop.permute.xlu1 %1486 }
 0x1dd   : > { %v3804_v0 = vpop.permute.xlu0 %1491 }
 0x1e0   : > { %v3810_v2 = vpop.permute.xlu1 %1496 }
 0x1e1   : > { %v3808_v1 = vpop.permute.xlu0 %1501 }
 0x1e4   : > { %v3814_v4 = vpop.permute.xlu1 %1506 }
 0x1e5   : > { %v3812_v3 = vpop.permute.xlu0 %1589 }
 0x1e8   : > { %v3818_v7 = vpop.permute.xlu1 %1613 }
 0x1e9   : > { %v3816_v5 = vpop.permute.xlu0 %1618 }
 0x1ec   : > { %v3822_v8 = vpop.permute.xlu1 %1623 }
 0x1ed   : > { %v3820_v47 = vpop.permute.xlu0 %1628 }
 0x1f0   : > { %v3826_v10 = vpop.permute.xlu1 %1633 }
 0x1f1   : > { %v3824_v9 = vpop.permute.xlu0 %1638 }
 0x1f4   : > { %v3830_v35 = vpop.permute.xlu1 %1719 }
 0x1f5   : > { %v3828_v11 = vpop.permute.xlu0 %1743 }
 0x1f8   : > { %v3834_v13 = vpop.permute.xlu1 %1748 }
 0x1f9   : > { %v3832_v12 = vpop.permute.xlu0 %1753 }
 0x1fc   : > { %v3838_v52 = vpop.permute.xlu1 %1758 }
 0x1fd   : > { %v3836_v14 = vpop.permute.xlu0 %1763 }
 0x200   : > { %v3842_v6 = vpop.permute.xlu1 %1768 }
 0x201   : > { %v3840_v59 = vpop.permute.xlu0 %1850 }
 0x204   : > { %v3846_v16 = vpop.permute.xlu1 %1874 }
 0x205   : > { %v3844_v15 = vpop.permute.xlu0 %1879 }
 0x208   : > { %v3850_v44 = vpop.permute.xlu1 %1884 }
 0x209   : > { %v3848_v17 = vpop.permute.xlu0 %1889 }
 0x20c   : > { %v3854_v19 = vpop.permute.xlu1 %1894 }
 0x20d   : > { %v3852_v18 = vpop.permute.xlu0 %1899 }
 0x210   : > { %v1991_v22 = vpop.permute.xlu1 %1990 }
 0x211   : > { %v3856_v21 = vpop.permute.xlu0 %1995 }
 0x214   : > { %v3892_v57 = vpop.permute.xlu1 %2000 }
 0x215   : > { %v2006_v31 = vpop.permute.xlu0 %2005 }
 0x289   : > { %v3858_v23 = vpop.f32.mrb[0].mxu0 }
 0x28a   : > { %v3860_v24 = vpop.f32.mrb[0].mxu1  ;;  %v3862_v25 = vpop.f32.mrb[1].mxu0  ;;  %v2018_v27 = vmul.f32 %v1991_v22, %v3858_v23  ;;  %v1374_v28 = vmul.f32 %v1347_v53, %v3858_v23  ;;  %v1253_v45 = vmul.f32 %v3622_v49, %v3858_v23 }
 0x28b   : > { %v3864_v26 = vpop.f32.mrb[1].mxu1  ;;  %v1380_v34 = vmul.f32 %v1362_v54, %v3860_v24  ;;  %v2024_v43 = vmul.f32 %v2006_v31, %v3860_v24  ;;  %v2019_v63 = vmul.f32 %v1991_v22, %v3862_v25  ;;  %v1375_v41 = vmul.f32 %v1347_v53, %v3862_v25  ;;  %v3904_v53 = vpop.permute.xlu1 %2010 }
 0x28c   : > { %2042 = vrot.lane.b32.xlu0 %v2018_v27, %s2964_s21  ;;  %1398 = vrot.lane.b32.xlu1 %v1374_v28, %s2959_s17  ;;  %v1256_v39 = vmul.f32 %v3622_v49, %v3860_v24  ;;  %v1592_v22 = vmul.f32 %v3812_v3, %v3858_v23 }
 0x28d   : > { %v3870_v32 = vpop.f32.mrb[2].mxu0 }
 0x28e   : > { %v3872_v33 = vpop.f32.mrb[2].mxu1  ;;  %v3874_v37 = vpop.f32.mrb[3].mxu0 }
 0x28f   : > { %v3876_v30 = vpop.f32.mrb[3].mxu1 }
 0x290   : > { %1410 = vrot.lane.b32.xlu1 %v1380_v34, %s2959_s17  ;;  %2054 = vrot.lane.b32.xlu0 %v2024_v43, %s2964_s21  ;;  %v2025_v34 = vmul.f32 %v2006_v31, %v3864_v26  ;;  %v1381_v43 = vmul.f32 %v1362_v54, %v3864_v26  ;;  %v1460_v54 = vmul.f32 %v3802_v62, %v3858_v23 }
 0x291   : > { %v3882_v38 = vpop.f32.mrb[4].mxu0  ;;  %v1641_v31 = vmul.f32 %v3818_v7, %v1592_v22 }
 0x292   : > { %v3884_v36 = vpop.f32.mrb[4].mxu1  ;;  %v3886_v27 = vpop.f32.mrb[5].mxu0 }
 0x293   : > { %v3888_v28 = vpop.f32.mrb[5].mxu1 }
 0x294   : > { %2044 = vrot.lane.b32.xlu1 %v2019_v63, %s2964_s21  ;;  %1400 = vrot.lane.b32.xlu0 %v1375_v41, %s2959_s17  ;;  %v1295_v63 = vmul.f32 %v3782_v48, %v1253_v45  ;;  %v1298_v41 = vmul.f32 %v3784_v56, %v1256_v39  ;;  %v1466_v39 = vmul.f32 %v3802_v62, %v3860_v24  ;;  %v2121_v45 = vpop.permute.xlu1 %2120 }
 0x296   : > { %v1515_v56 = vmul.f32 %v3810_v2, %v1466_v39 }
 0x298   : > { %2056 = vrot.lane.b32.xlu1 %v2025_v34, %s2964_s21  ;;  %1412 = vrot.lane.b32.xlu0 %v1381_v43, %s2959_s17  ;;  %v1509_v34 = vmul.f32 %v3800_v46, %v1460_v54  ;;  %v1598_v43 = vmul.f32 %v3812_v3, %v3860_v24  ;;  %v3930_v22 = vpop.permute.xlu1 %2130 }
 0x299   : > { %4597 = vst [vmem:[#allocation30_spill] sm:$0xff] %v3930_v22 }
 0x29a   : > { %v1647_v48 = vmul.f32 %v3820_v47, %v1598_v43  ;;  %v1728_v43 = vmul.f32 %v3830_v35, %v3860_v24 }
 0x29c   : > { %1307 = vrot.lane.b32.xlu1 %v1295_v63, %s2967_s9  ;;  %1313 = vrot.lane.b32.xlu0 %v1298_v41, %s2967_s9  ;;  %v1461_v63 = vmul.f32 %v3802_v62, %v3862_v25  ;;  %v1722_v41 = vmul.f32 %v3830_v35, %v3858_v23 }
 0x29e   : > { %v1510_v54 = vmul.f32 %v3800_v46, %v1461_v63  ;;  %v1723_v46 = vmul.f32 %v3830_v35, %v3862_v25  ;;  %v3946_v63 = vpop.permute.xlu1 %2140 }
 0x2a0   : > { %1665 = vrot.lane.b32.xlu1 %v1641_v31, %s2965_s30  ;;  %1533 = vrot.lane.b32.xlu0 %v1509_v34, %s2972_s15  ;;  %v1771_v31 = vmul.f32 %v3828_v11, %v1722_v41  ;;  %v1467_v34 = vmul.f32 %v3802_v62, %v3864_v26  ;;  %v3950_v41 = vpop.permute.xlu0 %2015 }
 0x2a2   : > { %v1516_v39 = vmul.f32 %v3810_v2, %v1467_v34  ;;  %v1859_v34 = vmul.f32 %v3840_v59, %v3860_v24 }
 0x2a4   : > { %1677 = vrot.lane.b32.xlu1 %v1647_v48, %s2965_s30  ;;  %1545 = vrot.lane.b32.xlu0 %v1515_v56, %s2972_s15  ;;  %v1777_v48 = vmul.f32 %v3838_v52, %v1728_v43  ;;  %v1853_v56 = vmul.f32 %v3840_v59, %v3858_v23  ;;  %v3960_v43 = vpop.permute.xlu1 %2096 }
 0x2a6   : > { %v1902_v2 = vmul.f32 %v3846_v16, %v1853_v56  ;;  %v3968_v56 = vpop.permute.xlu0 %2125 }
 0x2a8   : > { %1535 = vrot.lane.b32.xlu1 %v1510_v54, %s2972_s15  ;;  %1795 = vrot.lane.b32.xlu0 %v1771_v31, %s2973_s24  ;;  %v1772_v54 = vmul.f32 %v3828_v11, %v1723_v46  ;;  %v1729_v31 = vmul.f32 %v3830_v35, %v3864_v26  ;;  %v1854_v11 = vmul.f32 %v3840_v59, %v3862_v25 }
 0x2a9   : > { %v2099_v46 = vmul.f32 %v3960_v43, %v3858_v23 }
 0x2ac   : > { %1547 = vrot.lane.b32.xlu1 %v1516_v39, %s2972_s15  ;;  %1807 = vrot.lane.b32.xlu0 %v1777_v48, %s2973_s24  ;;  %v1778_v39 = vmul.f32 %v3838_v52, %v1729_v31  ;;  %v1908_v48 = vmul.f32 %v3848_v17, %v1859_v34  ;;  %v1860_v52 = vmul.f32 %v3840_v59, %v3864_v26  ;;  %v2136_v34 = vpop.permute.xlu0 %2135 }
 0x2ad   : > { %v2105_v31 = vmul.f32 %v3960_v43, %v3860_v24 }
 0x2ae   : > { %v1909_v22 = vmul.f32 %v3848_v17, %v1860_v52  ;;  %v1599_v17 = vmul.f32 %v3812_v3, %v3864_v26 }
 0x2b0   : > { %1797 = vrot.lane.b32.xlu1 %v1772_v54, %s2973_s24  ;;  %1926 = vrot.lane.b32.xlu0 %v1902_v2, %s2974_s11  ;;  %v1903_v54 = vmul.f32 %v3846_v16, %v1854_v11  ;;  %v2148_v2 = vmul.f32 %v2121_v45, %v2099_v46  ;;  %v1593_v16 = vmul.f32 %v3812_v3, %v3862_v25 }
 0x2b1   : > { %v1648_v52 = vmul.f32 %v3820_v47, %v1599_v17  ;;  %v2026_v47 = vmul.f32 %v3904_v53, %v3872_v33  ;;  %v1600_v17 = vmul.f32 %v3812_v3, %v3872_v33 }
 0x2b2   : > { %v1642_v46 = vmul.f32 %v3818_v7, %v1593_v16  ;;  %v1376_v7 = vmul.f32 %v3792_v51, %v3870_v32  ;;  %v1257_v16 = vmul.f32 %v3622_v49, %v3872_v33 }
 0x2b4   : > { %1809 = vrot.lane.b32.xlu1 %v1778_v39, %s2973_s24  ;;  %1938 = vrot.lane.b32.xlu0 %v1908_v48, %s2974_s11  ;;  %v2154_v39 = vmul.f32 %v2136_v34, %v2105_v31  ;;  %v2100_v48 = vmul.f32 %v3960_v43, %v3862_v25  ;;  %v2021_v31 = vmul.f32 %v3856_v21, %v3874_v37 }
 0x2b6   : > { %v2149_v11 = vmul.f32 %v2121_v45, %v2100_v48  ;;  %v2020_v45 = vmul.f32 %v3856_v21, %v3870_v32  ;;  %v1383_v48 = vmul.f32 %v3798_v60, %v3876_v30 }
 0x2b8   : > { %1928 = vrot.lane.b32.xlu1 %v1903_v54, %s2974_s11  ;;  %2172 = vrot.lane.b32.xlu0 %v2148_v2, %s2975_s23  ;;  %v2106_v54 = vmul.f32 %v3960_v43, %v3864_v26 }
 0x2ba   : > { %v2155_v2 = vmul.f32 %v2136_v34, %v2106_v54  ;;  %v1377_v34 = vmul.f32 %v3792_v51, %v3874_v37  ;;  %v1299_v51 = vmul.f32 %v3790_v50, %v1257_v16  ;;  %v1649_v50 = vmul.f32 %v3826_v10, %v1600_v17  ;;  %v4062_v16 = vpop.permute.xlu0 %2145 }
 0x2bb   : > { %v2101_v17 = vmul.f32 %v3960_v43, %v3870_v32 }
 0x2bc   : > { %1940 = vrot.lane.b32.xlu1 %v1909_v22, %s2974_s11  ;;  %2184 = vrot.lane.b32.xlu0 %v2154_v39, %s2975_s23  ;;  %v1382_v22 = vmul.f32 %v3798_v60, %v3872_v33  ;;  %v2027_v39 = vmul.f32 %v3904_v53, %v3876_v30  ;;  %v1594_v53 = vmul.f32 %v3812_v3, %v3870_v32 }
 0x2bd   : > { %v1462_v60 = vmul.f32 %v3802_v62, %v3870_v32 }
 0x2bf   : > { %v1511_v54 = vmul.f32 %v3806_v61, %v1462_v60  ;;  %v4076_v60 = vpop.permute.xlu1 %2240 }
 0x2c0   : > { %2174 = vrot.lane.b32.xlu1 %v2149_v11, %s2975_s23  ;;  %1667 = vrot.lane.b32.xlu0 %v1642_v46, %s2965_s30  ;;  %v1254_v11 = vmul.f32 %v3622_v49, %v3870_v32  ;;  %v1643_v46 = vmul.f32 %v3816_v5, %v1594_v53  ;;  %v4074_v53 = vpop.permute.xlu0 %2235 }
 0x2c2   : > { %v1296_v21 = vmul.f32 %v3780_v42, %v1254_v11  ;;  %v1468_v42 = vmul.f32 %v3802_v62, %v3872_v33 }
 0x2c4   : > { %2186 = vrot.lane.b32.xlu1 %v2155_v2, %s2975_s23  ;;  %1679 = vrot.lane.b32.xlu0 %v1648_v52, %s2965_s30  ;;  %v1517_v2 = vmul.f32 %v3808_v1, %v1468_v42  ;;  %v1463_v52 = vmul.f32 %v3802_v62, %v3874_v37 }
 0x2c8   : > { %1402 = vrot.lane.b32.xlu1 %v1376_v7, %s2959_s17  ;;  %2046 = vrot.lane.b32.xlu0 %v2020_v45, %s2964_s21  ;;  %v1724_v7 = vmul.f32 %v3830_v35, %v3870_v32  ;;  %v1512_v45 = vmul.f32 %v3806_v61, %v1463_v52  ;;  %v1855_v61 = vmul.f32 %v3840_v59, %v3870_v32  ;;  %v4092_v52 = vpop.permute.xlu0 %2245 }
 0x2cc   : > { %1414 = vrot.lane.b32.xlu1 %v1382_v22, %s2959_s17  ;;  %2058 = vrot.lane.b32.xlu0 %v2026_v47, %s2964_s21  ;;  %v1773_v22 = vmul.f32 %v3834_v13, %v1724_v7  ;;  %v1469_v47 = vmul.f32 %v3802_v62, %v3876_v30  ;;  %v4094_v7 = vpop.permute.xlu1 %2250 }
 0x2d0   : > { %2048 = vrot.lane.b32.xlu1 %v2021_v31, %s2964_s21  ;;  %1404 = vrot.lane.b32.xlu0 %v1377_v34, %s2959_s17  ;;  %v1730_v31 = vmul.f32 %v3830_v35, %v3872_v33  ;;  %v1518_v34 = vmul.f32 %v3808_v1, %v1469_v47  ;;  %v1731_v1 = vmul.f32 %v3830_v35, %v3876_v30 }
 0x2d1   : > { %v1601_v47 = vmul.f32 %v3812_v3, %v3876_v30 }
 0x2d4   : > { %2060 = vrot.lane.b32.xlu1 %v2027_v39, %s2964_s21  ;;  %1416 = vrot.lane.b32.xlu0 %v1383_v48, %s2959_s17  ;;  %v1779_v39 = vmul.f32 %v3836_v14, %v1730_v31  ;;  %v1725_v48 = vmul.f32 %v3830_v35, %v3874_v37  ;;  %v4106_v31 = vpop.permute.xlu0 %2255 }
 0x2d6   : > { %v1774_v11 = vmul.f32 %v3834_v13, %v1725_v48 }
 0x2d8   : > { %1315 = vrot.lane.b32.xlu1 %v1299_v51, %s2967_s9  ;;  %1309 = vrot.lane.b32.xlu0 %v1296_v21, %s2967_s9  ;;  %v1904_v51 = vmul.f32 %v3844_v15, %v1855_v61  ;;  %v1861_v21 = vmul.f32 %v3840_v59, %v3872_v33  ;;  %v1378_v61 = vmul.f32 %v3794_v55, %v3882_v38 }
 0x2da   : > { %v1910_v13 = vmul.f32 %v3854_v19, %v1861_v21 }
 0x2dc   : > { %1669 = vrot.lane.b32.xlu1 %v1643_v46, %s2965_s30  ;;  %1537 = vrot.lane.b32.xlu0 %v1511_v54, %s2972_s15  ;;  %v1780_v46 = vmul.f32 %v3836_v14, %v1731_v1  ;;  %v1856_v54 = vmul.f32 %v3840_v59, %v3874_v37  ;;  %v1595_v14 = vmul.f32 %v3812_v3, %v3874_v37 }
 0x2dd   : > { %v2028_v1 = vmul.f32 %v3950_v41, %v3884_v36 }
 0x2de   : > { %v1905_v42 = vmul.f32 %v3844_v15, %v1856_v54  ;;  %v1644_v15 = vmul.f32 %v3816_v5, %v1595_v14  ;;  %v1379_v54 = vmul.f32 %v3794_v55, %v3886_v27  ;;  %v1258_v55 = vmul.f32 %v3622_v49, %v3884_v36 }
 0x2e0   : > { %1681 = vrot.lane.b32.xlu1 %v1649_v50, %s2965_s30  ;;  %1549 = vrot.lane.b32.xlu0 %v1517_v2, %s2972_s15  ;;  %v2150_v50 = vmul.f32 %v3968_v56, %v2101_v17  ;;  %v1862_v2 = vmul.f32 %v3840_v59, %v3876_v30 }
 0x2e4   : > { %1539 = vrot.lane.b32.xlu1 %v1512_v45, %s2972_s15  ;;  %1799 = vrot.lane.b32.xlu0 %v1773_v22, %s2973_s24  ;;  %v1911_v45 = vmul.f32 %v3854_v19, %v1862_v2  ;;  %v2102_v22 = vmul.f32 %v3960_v43, %v3874_v37  ;;  %v1650_v19 = vmul.f32 %v3826_v10, %v1601_v47 }
 0x2e5   : > { %v1385_v2 = vmul.f32 %v3796_v58, %v3888_v28 }
 0x2e8   : > { %1551 = vrot.lane.b32.xlu1 %v1518_v34, %s2972_s15  ;;  %1811 = vrot.lane.b32.xlu0 %v1779_v39, %s2973_s24  ;;  %v4108_v34 = vpop.permute.xlu1 %2260  ;;  %v2151_v39 = vmul.f32 %v3968_v56, %v2102_v22  ;;  %v1464_v22 = vmul.f32 %v3802_v62, %v3882_v38 }
 0x2e9   : > { %4598 = vst [vmem:[#allocation31_spill] sm:$0xff] %v4108_v34 }
 0x2ec   : > { %1801 = vrot.lane.b32.xlu1 %v1774_v11, %s2973_s24  ;;  %1930 = vrot.lane.b32.xlu0 %v1904_v51, %s2974_s11  ;;  %v2022_v11 = vmul.f32 %v3892_v57, %v3882_v38  ;;  %v1384_v51 = vmul.f32 %v3796_v58, %v3884_v36  ;;  %v1596_v58 = vmul.f32 %v3812_v3, %v3882_v38 }
 0x2f0   : > { %1813 = vrot.lane.b32.xlu1 %v1780_v46, %s2973_s24  ;;  %1942 = vrot.lane.b32.xlu0 %v1910_v13, %s2974_s11  ;;  %v2023_v13 = vmul.f32 %v3892_v57, %v3886_v27  ;;  %v1255_v57 = vmul.f32 %v3622_v49, %v3882_v38 }
 0x2f4   : > { %1932 = vrot.lane.b32.xlu1 %v1905_v42, %s2974_s11  ;;  %2176 = vrot.lane.b32.xlu0 %v2150_v50, %s2975_s23  ;;  %v2029_v50 = vmul.f32 %v3950_v41, %v3888_v28  ;;  %v1300_v41 = vmul.f32 %v3788_v29, %v1258_v55  ;;  %v1602_v29 = vmul.f32 %v3812_v3, %v3884_v36 }
 0x2f8   : > { %1944 = vrot.lane.b32.xlu1 %v1911_v45, %s2974_s11  ;;  %1671 = vrot.lane.b32.xlu0 %v1644_v15, %s2965_s30  ;;  %v1297_v15 = vmul.f32 %v3786_v20, %v1255_v57  ;;  %v1513_v20 = vmul.f32 %v3804_v0, %v1464_v22 }
 0x2fc   : > { %2178 = vrot.lane.b32.xlu1 %v2151_v39, %s2975_s23  ;;  %1683 = vrot.lane.b32.xlu0 %v1650_v19, %s2965_s30  ;;  %v1645_v39 = vmul.f32 %v3822_v8, %v1596_v58  ;;  %v1470_v19 = vmul.f32 %v3802_v62, %v3884_v36 }
 0x2fe   : > { %v4114_v5 = vpop.permute.xlu1 %1398  ;;  %v4116_v48 = vpop.permute.xlu0 %2042 }
 0x300   : > { %1406 = vrot.lane.b32.xlu1 %v1378_v61, %s2959_s17  ;;  %2050 = vrot.lane.b32.xlu0 %v2022_v11, %s2964_s21 }
 0x302   : > { %v4124_v56 = vpop.permute.xlu1 %1410  ;;  %v4126_v10 = vpop.permute.xlu0 %2054 }
 0x304   : > { %1418 = vrot.lane.b32.xlu1 %v1384_v51, %s2959_s17  ;;  %2062 = vrot.lane.b32.xlu0 %v2028_v1, %s2964_s21  ;;  %v1651_v51 = vmul.f32 %v3824_v9, %v1602_v29  ;;  %v1519_v1 = vmul.f32 %v3814_v4, %v1470_v19  ;;  %v1237_v29 = vmul.f32 %v3768_v40, %v3858_v23 }
 0x306   : > { %v4134_v21 = vpop.permute.xlu1 %2044  ;;  %v4136_v46 = vpop.permute.xlu0 %1400 }
 0x308   : > { %2052 = vrot.lane.b32.xlu1 %v2023_v13, %s2964_s21  ;;  %1408 = vrot.lane.b32.xlu0 %v1379_v54, %s2959_s17  ;;  %v1465_v13 = vmul.f32 %v3802_v62, %v3886_v27  ;;  %v1726_v54 = vmul.f32 %v3830_v35, %v3882_v38 }
 0x30a   : > { %v4144_v17 = vpop.permute.xlu1 %2056  ;;  %v4146_v42 = vpop.permute.xlu0 %1412  ;;  %v1514_v57 = vmul.f32 %v3804_v0, %v1465_v13  ;;  %v1775_v55 = vmul.f32 %v3832_v12, %v1726_v54  ;;  %v1727_v13 = vmul.f32 %v3830_v35, %v3886_v27  ;;  %v1863_v54 = vmul.f32 %v3840_v59, %v3884_v36 }
 0x30c   : > { %2064 = vrot.lane.b32.xlu1 %v2029_v50, %s2964_s21  ;;  %1420 = vrot.lane.b32.xlu0 %v1385_v2, %s2959_s17  ;;  %s2562_s17 = smul.u32 48, %s3283_s0  ;;  %s4606_s21 = sld [smem:[#allocation16_spill]] }
 0x30e   : > { %v4158_v14 = vpop.permute.xlu1 %1307  ;;  %v4160_v45 = vpop.permute.xlu0 %1313 }
 0x310   : > { %1311 = vrot.lane.b32.xlu1 %v1297_v15, %s2967_s9  ;;  %1317 = vrot.lane.b32.xlu0 %v1300_v41, %s2967_s9  ;;  %v1471_v15 = vmul.f32 %v3802_v62, %v3888_v28  ;;  %v1732_v41 = vmul.f32 %v3830_v35, %v3884_v36  ;;  %v1857_v62 = vmul.f32 %v3840_v59, %v3882_v38 }
 0x312   : > { %v4170_v49 = vpop.permute.xlu1 %1665  ;;  %v4172_v47 = vpop.permute.xlu0 %1533  ;;  %v1781_v0 = vmul.f32 %v3842_v6, %v1732_v41  ;;  %v1912_v41 = vmul.f32 %v3852_v18, %v1863_v54  ;;  %s2563_s9 = smul.u32 12, %s4606_s21 }
 0x314   : > { %1673 = vrot.lane.b32.xlu1 %v1645_v39, %s2965_s30  ;;  %1541 = vrot.lane.b32.xlu0 %v1513_v20, %s2972_s15  ;;  %v1520_v39 = vmul.f32 %v3814_v4, %v1471_v15  ;;  %v2108_v20 = vmul.f32 %v3960_v43, %v3876_v30  ;;  %v1776_v15 = vmul.f32 %v3832_v12, %v1727_v13  ;;  %s2341_s22 = sadd.s32 %s2933_s10, %s2563_s9  ;;  %s2330_s10 = scalar_lea.sflag [#allocation6], %s3283_s0 }
 0x315   : > { %v1238_v12 = vmul.f32 %v3768_v40, %v3862_v25  ;;  %s2553_s19 = sshll.u32 %s2341_s22, 7 }
 0x316   : > { %v4182_v61 = vpop.permute.xlu1 %1677  ;;  %v4184_v11 = vpop.permute.xlu0 %1545  ;;  %v2157_v4 = vmul.f32 %v3946_v63, %v2108_v20  ;;  %s4453_s12 = scalar_lea.hbm %s4608_s20, %s2553_s19 }
 0x317   : > { %v1326_v40 = vadd.f32 %v4158_v14, %v1238_v12 }
 0x318   : > { %1685 = vrot.lane.b32.xlu1 %v1651_v51, %s2965_s30  ;;  %1553 = vrot.lane.b32.xlu0 %v1519_v1, %s2972_s15  ;;  %v1906_v1 = vmul.f32 %v3850_v44, %v1857_v62  ;;  %v4599_v62 = vld [vmem:[#allocation26_spill] sm:$0xff] }
 0x319   : > { %v1244_v25 = vmul.f32 %v4599_v62, %v3864_v26  ;;  %v1422_v26 = vsel %vm843_vm8, %v4114_v5, %v4136_v46  ;;  %v2107_v46 = vmul.f32 %v3960_v43, %v3872_v33 }
 0x31a   : > { %v4194_v50 = vpop.permute.xlu1 %1535  ;;  %v1796_v2 = vpop.permute.xlu0 %1795 }
 0x31c   : > { %1543 = vrot.lane.b32.xlu1 %v1514_v57, %s2972_s15  ;;  %1803 = vrot.lane.b32.xlu0 %v1775_v55, %s2973_s24  ;;  %v1325_v57 = vadd.f32 %v4158_v14, %v1237_v29  ;;  %v1243_v29 = vmul.f32 %v4599_v62, %v3860_v24  ;;  %v1597_v24 = vmul.f32 %v3812_v3, %v3886_v27 }
 0x31d   : > { %v1558_v62 = vsel %vm1557_vm5, %v4172_v47, %v4194_v50 }
 0x31e   : > { %v4204_v58 = vpop.permute.xlu1 %1547  ;;  %v4206_v22 = vpop.permute.xlu0 %1807  ;;  %v1440_v20 = vadd.f32 %v4114_v5, %v1325_v57  ;;  %v4600_v57 = vld [vmem:[#allocation30_spill] sm:$0xff]  ;;  %v2104_v5 = vmul.f32 %v3960_v43, %v3886_v27 }
 0x320   : > { %1555 = vrot.lane.b32.xlu1 %v1520_v39, %s2972_s15  ;;  %1815 = vrot.lane.b32.xlu0 %v1781_v0, %s2973_s24  ;;  %v1733_v39 = vmul.f32 %v3830_v35, %v3888_v28  ;;  %v2103_v0 = vmul.f32 %v3960_v43, %v3882_v38  ;;  %v1331_v35 = vadd.f32 %v4160_v45, %v1243_v29  ;;  %s2799_s15 = sshll.u32 %s2976_s25, 4  ;;  %s2800_s15 = int_to_ptr.vmem [resolvable:$false] %s2799_s15 }
 0x321   : > { %v1646_v29 = vmul.f32 %v3822_v8, %v1597_v24  ;;  %v1561_v24 = vsel %vm1557_vm5, %v4184_v11, %v4204_v58  ;;  %v2109_v58 = vmul.f32 %v3960_v43, %v3884_v36 }
 0x322   : > { %v4218_v19 = vpop.permute.xlu1 %1797  ;;  %v1927_v51 = vpop.permute.xlu0 %1926  ;;  %v1782_v54 = vmul.f32 %v3842_v6, %v1733_v39  ;;  %v2152_v34 = vmul.f32 %v4600_v57, %v2103_v0  ;;  %v1446_v39 = vadd.f32 %v4124_v56, %v1331_v35 }
 0x323   : > { %v1820_v0 = vsel %vm1819_vm4, %v1796_v2, %v4218_v19  ;;  %v1441_v2 = vadd.f32 %v1422_v26, %v1326_v40 }
 0x324   : > { %2190 = vrot.lane.b32.xlu1 %v2157_v4, %s2975_s23  ;;  %1934 = vrot.lane.b32.xlu0 %v1906_v1, %s2974_s11  ;;  %v1858_v4 = vmul.f32 %v3840_v59, %v3886_v27  ;;  %v1582_v12 = vadd.f32 %v4184_v11, %v1446_v39  ;;  %v2156_v11 = vmul.f32 %v3946_v63, %v2107_v46 }
 0x325   : > { %v1577_v50 = vadd.f32 %v1558_v62, %v1441_v2 }
 0x326   : > { %v4229_v23 = vpop.permute.xlu1 %1809  ;;  %v4231_v55 = vpop.permute.xlu0 %1938  ;;  %v1907_v6 = vmul.f32 %v3850_v44, %v1858_v4  ;;  %v1332_v44 = vadd.f32 %v4160_v45, %v1244_v25  ;;  %v2110_v45 = vmul.f32 %v3960_v43, %v3888_v28 }
 0x328   : > { %1805 = vrot.lane.b32.xlu1 %v1776_v15, %s2973_s24  ;;  %1946 = vrot.lane.b32.xlu0 %v1912_v41, %s2974_s11  ;;  %v1576_v15 = vadd.f32 %v4172_v47, %v1440_v20  ;;  %v1864_v41 = vmul.f32 %v3840_v59, %v3888_v28  ;;  %v1425_v47 = vsel %vm843_vm8, %v4124_v56, %v4146_v42 }
 0x329   : > { %v1447_v56 = vadd.f32 %v1425_v47, %v1332_v44  ;;  %v1713_v42 = vadd.f32 %v4182_v61, %v1582_v12 }
 0x32a   : > { %v4249_v1 = vpop.permute.xlu1 %1928  ;;  %v2173_v13 = vpop.permute.xlu0 %2172  ;;  %v1707_v59 = vadd.f32 %v4170_v49, %v1576_v15  ;;  %v1913_v35 = vmul.f32 %v3852_v18, %v1864_v41  ;;  %v1823_v15 = vsel %vm1819_vm4, %v4206_v22, %v4229_v23  ;;  %v2153_v18 = vmul.f32 %v4600_v57, %v2104_v5 }
 0x32b   : > { %v1951_v8 = vsel %vm1950_vm6, %v1927_v51, %v4249_v1  ;;  %v1583_v22 = vadd.f32 %v1561_v24, %v1447_v56  ;;  %v1844_v41 = vadd.f32 %v1823_v15, %v1713_v42 }
 0x32c   : > { %1817 = vrot.lane.b32.xlu1 %v1782_v54, %s2973_s24  ;;  %2180 = vrot.lane.b32.xlu0 %v2152_v34, %s2975_s23  ;;  %v1603_v34 = vmul.f32 %v3812_v3, %v3888_v28  ;;  %v1838_v3 = vadd.f32 %v1820_v0, %v1707_v59  ;;  %s2801_s24 = scalar_lea.vmem %s2800_s15, 1536 }
 0x32e   : > { %v1941_v14 = vpop.permute.xlu1 %1940  ;;  %v2185_v20 = vpop.permute.xlu0 %2184  ;;  %v1652_v54 = vmul.f32 %v3824_v9, %v1603_v34  ;;  %v1969_v40 = vadd.f32 %v1951_v8, %v1838_v3 }
 0x32f   : > { %v1954_v9 = vsel %vm1950_vm6, %v4231_v55, %v1941_v14 }
 0x330   : > { %1936 = vrot.lane.b32.xlu1 %v1907_v6, %s2974_s11  ;;  %1675 = vrot.lane.b32.xlu0 %v1646_v29, %s2965_s30  ;;  %v1975_v63 = vadd.f32 %v1954_v9, %v1844_v41 }
 0x332   : > { %v2175_v51 = vpop.permute.xlu1 %2174  ;;  %v1668_v4 = vpop.permute.xlu0 %1667 }
 0x333   : > { %v1689_v25 = vsel %vm936_vm7, %v4170_v49, %v1668_v4  ;;  %v2066_v49 = vsel %vm861_vm14, %v4116_v48, %v4134_v21  ;;  %v2197_v55 = vsel %vm2196_vm9, %v2173_v13, %v2175_v51  ;;  %v2159_v48 = vmul.f32 %v4062_v16, %v2110_v45 }
 0x334   : > { %v1708_v6 = vadd.f32 %v1689_v25, %v1577_v50  ;;  %1948 = vrot.lane.b32.xlu1 %v1913_v35, %s2974_s11  ;;  %1687 = vrot.lane.b32.xlu0 %v1652_v54, %s2965_s30  ;;  %v2084_v34 = vadd.f32 %v2066_v49, %v1969_v40  ;;  %v4601_v35 = vld [vmem:[#allocation29_spill] sm:$0xff]  ;;  %s4430_s30 = scalar_lea.vmem [#allocation9], %s2562_s17 }
 0x335   : > { %v1245_v54 = vmul.f32 %v4601_v35, %v3872_v33  ;;  %v1246_v24 = vmul.f32 %v4601_v35, %v3876_v30  ;;  %s2344_s16 = sshll.u32 %s4430_s30, 4  ;;  %s4447_s16 = int_to_ptr.vmem [resolvable:$true] %s2344_s16 }
 0x336   : > { %v1839_v39 = vadd.f32 %v4218_v19, %v1708_v6  ;;  %v2187_v0 = vpop.permute.xlu1 %2186  ;;  %v1680_v29 = vpop.permute.xlu0 %1679  ;;  %v2215_v44 = vadd.f32 %v2197_v55, %v2084_v34  ;;  %s2795_s28 = scalar_lea.vmem %s4447_s16, 768  ;;  %p2802_p7 = scmp.lt.s32.totalorder %s4447_s16, %s2800_s15 }
 0x337   : > { %v1692_v57 = vsel %vm936_vm7, %v4182_v61, %v1680_v29  ;;  %v2158_v61 = vmul.f32 %v4062_v16, %v2109_v58  ;;  %v2200_v2 = vsel %vm2196_vm9, %v2185_v20, %v2187_v0  ;;  %p2796_p1 = scmp.ne.s32.totalorder %s4447_s16, %s2795_s28  ;;  %p2803_p4 = scmp.lt.s32.totalorder %s2801_s24, %s2795_s28 }
 0x338   : > { %v1970_v26 = vadd.f32 %v4249_v1, %v1839_v39  ;;  %v1714_v43 = vadd.f32 %v1692_v57, %v1583_v22  ;;  %2182 = vrot.lane.b32.xlu1 %v2153_v18, %s2975_s23  ;;  %2188 = vrot.lane.b32.xlu0 %v2156_v11, %s2975_s23  ;;  %v2069_v1 = vsel %vm861_vm14, %v4126_v10, %v4144_v17  ;;  %v4602_v39 = vld [vmem:[#allocation25_spill] sm:$0xff] }
 0x339   : > { %v2090_v12 = vadd.f32 %v2069_v1, %v1975_v63  ;;  %v1239_v33 = vmul.f32 %v4602_v39, %v3870_v32  ;;  %v1240_v63 = vmul.f32 %v4602_v39, %v3874_v37  ;;  %p2797_p11 = pnand %p2796_p1, %p4609_p3  ;;  %p2804_p2 = por %p2803_p4, %p2802_p7 }
 0x33a   : > { %v2085_v19 = vadd.f32 %v4134_v21, %v1970_v26  ;;  %v1845_v59 = vadd.f32 %v4229_v23, %v1714_v43  ;;  %v4324_v62 = vpop.permute.xlu1 %1402  ;;  %v4326_v13 = vpop.permute.xlu0 %2046  ;;  %v2263_v23 = vadd.f32 %v4074_v53, %v2215_v44 }
 0x33b   : > { %v2221_v3 = vadd.f32 %v2200_v2, %v2090_v12  ;;  %p2798_p12 = pneg %p2797_p11 }
 0x33c   : > { %v1976_v8 = vadd.f32 %v1941_v14, %v1845_v59  ;;  %2194 = vrot.lane.b32.xlu1 %v2159_v48, %s2975_s23  ;;  %2192 = vrot.lane.b32.xlu0 %v2158_v61, %s2975_s23  ;;  %v2216_v21 = vadd.f32 %v2175_v51, %v2085_v19 }
 0x33d   : > { %v2269_v14 = vadd.f32 %v4094_v7, %v2221_v3  ;;  %p2805_p8 = pnand %p2804_p2, %p2798_p12 }
 0x33e   : > { %v2091_v5 = vadd.f32 %v4144_v17, %v1976_v8  ;;  %v1415_v46 = vpop.permute.xlu1 %1414  ;;  %v2059_v16 = vpop.permute.xlu0 %2058  ;;  %v2264_v45 = vadd.f32 %v4074_v53, %v2216_v21 }
 0x340   : > { %2287 = vrot.lane.b32.xlu0 %v2263_v23, %s2975_s23  ;;  %2289 = vrot.lane.b32.xlu1 %v2264_v45, %s2975_s23  ;;  %v2222_v10 = vadd.f32 %v2187_v0, %v2091_v5 }
 0x342   : > { %v4341_v20 = vpop.permute.xlu1 %2048  ;;  %v1405_v47 = vpop.permute.xlu0 %1404  ;;  %v2270_v50 = vadd.f32 %v4094_v7, %v2222_v10 }
 0x343   : > { %v1423_v12 = vsel %vm843_vm8, %v4324_v62, %v1405_v47 }
 0x344   : > { %2299 = vrot.lane.b32.xlu0 %v2269_v14, %s2975_s23  ;;  %2301 = vrot.lane.b32.xlu1 %v2270_v50, %s2975_s23 }
 0x346   : > { %v4346_v17 = vpop.permute.xlu1 %2060  ;;  %v1417_v51 = vpop.permute.xlu0 %1416 }
 0x347   : > { %v2070_v53 = vsel %vm861_vm14, %v2059_v16, %v4346_v17  ;;  %v1426_v4 = vsel %vm843_vm8, %v1415_v46, %v1417_v51 }
 0x34a   : > { %v1316_v15 = vpop.permute.xlu1 %1315  ;;  %v1310_v7 = vpop.permute.xlu0 %1309 }
 0x34b   : > { %v1333_v40 = vadd.f32 %v1316_v15, %v1245_v54  ;;  %v1334_v25 = vadd.f32 %v1316_v15, %v1246_v24  ;;  %v1327_v0 = vadd.f32 %v1310_v7, %v1239_v33  ;;  %v1328_v19 = vadd.f32 %v1310_v7, %v1240_v63 }
 0x34d   : > { %v1449_v56 = vadd.f32 %v1426_v4, %v1334_v25  ;;  %v1448_v42 = vadd.f32 %v1415_v46, %v1333_v40  ;;  %v1442_v34 = vadd.f32 %v4324_v62, %v1327_v0  ;;  %v1443_v37 = vadd.f32 %v1423_v12, %v1328_v19 }
 0x34e   : > { %v1670_v6 = vpop.permute.xlu1 %1669  ;;  %v1538_v9 = vpop.permute.xlu0 %1537  ;;  %v2067_v62 = vsel %vm861_vm14, %v4326_v13, %v4341_v20 }
 0x34f   : > { %v1578_v26 = vadd.f32 %v1538_v9, %v1442_v34 }
 0x351   : > { %v1709_v32 = vadd.f32 %v1670_v6, %v1578_v26 }
 0x352   : > { %v1682_v18 = vpop.permute.xlu1 %1681  ;;  %v1550_v11 = vpop.permute.xlu0 %1549 }
 0x353   : > { %v1584_v58 = vadd.f32 %v1550_v11, %v1448_v42 }
 0x355   : > { %v1715_v49 = vadd.f32 %v1682_v18, %v1584_v58 }
 0x356   : > { %v1540_v22 = vpop.permute.xlu1 %1539  ;;  %v1800_v41 = vpop.permute.xlu0 %1799 }
 0x357   : > { %v1559_v8 = vsel %vm1557_vm5, %v1538_v9, %v1540_v22 }
 0x358   : > { %v1579_v3 = vadd.f32 %v1559_v8, %v1443_v37 }
 0x35a   : > { %v1552_v29 = vpop.permute.xlu1 %1551  ;;  %v1812_v30 = vpop.permute.xlu0 %1811 }
 0x35b   : > { %v1562_v45 = vsel %vm1557_vm5, %v1550_v11, %v1552_v29 }
 0x35c   : > { %v1585_v47 = vadd.f32 %v1562_v45, %v1449_v56 }
 0x35e   : > { %v1802_v55 = vpop.permute.xlu1 %1801  ;;  %v1931_v57 = vpop.permute.xlu0 %1930 }
 0x35f   : > { %v1821_v61 = vsel %vm1819_vm4, %v1800_v41, %v1802_v55 }
 0x360   : > { %v1840_v23 = vadd.f32 %v1821_v61, %v1709_v32 }
 0x362   : > { %v1814_v43 = vpop.permute.xlu1 %1813  ;;  %v1943_v48 = vpop.permute.xlu0 %1942 }
 0x363   : > { %v1824_v44 = vsel %vm1819_vm4, %v1812_v30, %v1814_v43 }
 0x364   : > { %v1846_v59 = vadd.f32 %v1824_v44, %v1715_v49 }
 0x366   : > { %v1933_v1 = vpop.permute.xlu1 %1932  ;;  %v2177_v2 = vpop.permute.xlu0 %2176 }
 0x367   : > { %v1952_v21 = vsel %vm1950_vm6, %v1931_v57, %v1933_v1 }
 0x368   : > { %v1971_v5 = vadd.f32 %v1952_v21, %v1840_v23 }
 0x36a   : > { %v1945_v46 = vpop.permute.xlu1 %1944  ;;  %v1672_v16 = vpop.permute.xlu0 %1671  ;;  %v2086_v54 = vadd.f32 %v2067_v62, %v1971_v5 }
 0x36b   : > { %v1955_v10 = vsel %vm1950_vm6, %v1943_v48, %v1945_v46  ;;  %v1690_v14 = vsel %vm936_vm7, %v1670_v6, %v1672_v16 }
 0x36c   : > { %v1977_v50 = vadd.f32 %v1955_v10, %v1846_v59  ;;  %v1710_v51 = vadd.f32 %v1690_v14, %v1579_v3  ;;  %v4604_v3 = vld [vmem:[#allocation28_spill] sm:$0xff] }
 0x36d   : > { %v1247_v5 = vmul.f32 %v4604_v3, %v3884_v36 }
 0x36e   : > { %v1841_v4 = vadd.f32 %v1802_v55, %v1710_v51  ;;  %v2179_v35 = vpop.permute.xlu1 %2178  ;;  %v1684_v24 = vpop.permute.xlu0 %1683  ;;  %v4372_v15 = vadd.f32 %v2070_v53, %v1977_v50 }
 0x36f   : > { %v2198_v7 = vsel %vm2196_vm9, %v2177_v2, %v2179_v35  ;;  %v1693_v40 = vsel %vm936_vm7, %v1682_v18, %v1684_v24 }
 0x370   : > { %v1972_v25 = vadd.f32 %v1933_v1, %v1841_v4  ;;  %v2217_v42 = vadd.f32 %v2198_v7, %v2086_v54  ;;  %v1716_v6 = vadd.f32 %v1693_v40, %v1585_v47 }
 0x372   : > { %v2087_v9 = vadd.f32 %v4341_v20, %v1972_v25  ;;  %v2265_v11 = vadd.f32 %v4076_v60, %v2217_v42  ;;  %v1847_v58 = vadd.f32 %v1814_v43, %v1716_v6  ;;  %v1407_v13 = vpop.permute.xlu1 %1406  ;;  %v4378_v56 = vpop.permute.xlu0 %2050 }
 0x374   : > { %v2218_v49 = vadd.f32 %v2179_v35, %v2087_v9  ;;  %2291 = vrot.lane.b32.xlu0 %v2265_v11, %s2975_s23  ;;  %v1978_v53 = vadd.f32 %v1945_v46, %v1847_v58 }
 0x376   : > { %v2266_v22 = vadd.f32 %v4076_v60, %v2218_v49  ;;  %v1419_v41 = vpop.permute.xlu1 %1418  ;;  %v4382_v39 = vpop.permute.xlu0 %2062  ;;  %v2093_v18 = vadd.f32 %v4346_v17, %v1978_v53  ;;  %v4603_v17 = vld [vmem:[#allocation27_spill] sm:$0xff] }
 0x377   : > { %v1241_v19 = vmul.f32 %v4603_v17, %v3882_v38  ;;  %v1242_v12 = vmul.f32 %v4603_v17, %v3886_v27  ;;  %v1248_v38 = vmul.f32 %v4604_v3, %v3888_v28  ;;  %v4605_v3 = vld [vmem:[#allocation31_spill] sm:$0xff] }
 0x378   : > { %2293 = vrot.lane.b32.xlu1 %v2266_v22, %s2975_s23 }
 0x37a   : > { %v4386_v20 = vpop.permute.xlu1 %2052  ;;  %v1409_v33 = vpop.permute.xlu0 %1408 }
 0x37b   : > { %v1424_v10 = vsel %vm843_vm8, %v1407_v13, %v1409_v33 }
 0x37e   : > { %v4388_v0 = vpop.permute.xlu1 %2064  ;;  %v1421_v29 = vpop.permute.xlu0 %1420 }
 0x37f   : > { %v1427_v36 = vsel %vm843_vm8, %v1419_v41, %v1421_v29 }
 0x382   : > { %v1312_v30 = vpop.permute.xlu1 %1311  ;;  %v1318_v34 = vpop.permute.xlu0 %1317 }
 0x383   : > { %v1329_v32 = vadd.f32 %v1312_v30, %v1241_v19  ;;  %v1330_v23 = vadd.f32 %v1312_v30, %v1242_v12  ;;  %v1335_v46 = vadd.f32 %v1318_v34, %v1247_v5  ;;  %v1336_v51 = vadd.f32 %v1318_v34, %v1248_v38 }
 0x384   : > { %v2068_v34 = vsel %vm861_vm14, %v4378_v56, %v4386_v20 }
 0x385   : > { %v1444_v37 = vadd.f32 %v1407_v13, %v1329_v32  ;;  %v1445_v50 = vadd.f32 %v1424_v10, %v1330_v23  ;;  %v1450_v62 = vadd.f32 %v1419_v41, %v1335_v46  ;;  %v1451_v40 = vadd.f32 %v1427_v36, %v1336_v51 }
 0x386   : > { %v1674_v55 = vpop.permute.xlu1 %1673  ;;  %v1542_v57 = vpop.permute.xlu0 %1541 }
 0x387   : > { %v1580_v14 = vadd.f32 %v1542_v57, %v1444_v37 }
 0x389   : > { %v1711_v24 = vadd.f32 %v1674_v55, %v1580_v14 }
 0x38a   : > { %v1686_v63 = vpop.permute.xlu1 %1685  ;;  %v1554_v26 = vpop.permute.xlu0 %1553 }
 0x38b   : > { %v1586_v25 = vadd.f32 %v1554_v26, %v1450_v62 }
 0x38e   : > { %v1544_v60 = vpop.permute.xlu1 %1543  ;;  %v1804_v43 = vpop.permute.xlu0 %1803 }
 0x38f   : > { %v1560_v27 = vsel %vm1557_vm5, %v1542_v57, %v1544_v60 }
 0x390   : > { %v1581_v47 = vadd.f32 %v1560_v27, %v1445_v50 }
 0x392   : > { %v1556_v48 = vpop.permute.xlu1 %1555  ;;  %v1816_v44 = vpop.permute.xlu0 %1815 }
 0x393   : > { %v1563_v28 = vsel %vm1557_vm5, %v1554_v26, %v1556_v48 }
 0x394   : > { %v1587_v11 = vadd.f32 %v1563_v28, %v1451_v40 }
 0x396   : > { %v2191_v59 = vpop.permute.xlu1 %2190  ;;  %v1935_v61 = vpop.permute.xlu0 %1934 }
 0x397   : > { %v2224_v1 = vadd.f32 %v2191_v59, %v2093_v18  ;;  %v1717_v18 = vadd.f32 %v1686_v63, %v1586_v25 }
 0x399   : > { %v2272_v2 = vadd.f32 %v4106_v31, %v2224_v1 }
 0x39a   : > { %v1806_v8 = vpop.permute.xlu1 %1805  ;;  %v1947_v21 = vpop.permute.xlu0 %1946 }
 0x39b   : > { %2305 = vrot.lane.b32.xlu1 %v2272_v2, %s2975_s23  ;;  %v1822_v4 = vsel %vm1819_vm4, %v1804_v43, %v1806_v8 }
 0x39c   : > { %v1842_v9 = vadd.f32 %v1822_v4, %v1711_v24 }
 0x39e   : > { %v1818_v16 = vpop.permute.xlu1 %1817  ;;  %v2181_v45 = vpop.permute.xlu0 %2180 }
 0x39f   : > { %v1825_v53 = vsel %vm1819_vm4, %v1816_v44, %v1818_v16 }
 0x3a2   : > { %v1937_v35 = vpop.permute.xlu1 %1936  ;;  %v1676_v54 = vpop.permute.xlu0 %1675 }
 0x3a3   : > { %v1691_v7 = vsel %vm936_vm7, %v1674_v55, %v1676_v54  ;;  %v1953_v42 = vsel %vm1950_vm6, %v1935_v61, %v1937_v35  ;;  %v1848_v55 = vadd.f32 %v1825_v53, %v1717_v18 }
 0x3a4   : > { %v1712_v6 = vadd.f32 %v1691_v7, %v1581_v47  ;;  %v1973_v22 = vadd.f32 %v1953_v42, %v1842_v9 }
 0x3a6   : > { %v1843_v58 = vadd.f32 %v1806_v8, %v1712_v6  ;;  %v1949_v13 = vpop.permute.xlu1 %1948  ;;  %v1688_v49 = vpop.permute.xlu0 %1687  ;;  %v2088_v48 = vadd.f32 %v2068_v34, %v1973_v22 }
 0x3a7   : > { %v1694_v41 = vsel %vm936_vm7, %v1686_v63, %v1688_v49  ;;  %v1956_v30 = vsel %vm1950_vm6, %v1947_v21, %v1949_v13  ;;  %v2071_v21 = vsel %vm861_vm14, %v4382_v39, %v4388_v0 }
 0x3a8   : > { %v1718_v33 = vadd.f32 %v1694_v41, %v1587_v11  ;;  %v1974_v29 = vadd.f32 %v1937_v35, %v1843_v58  ;;  %v1979_v17 = vadd.f32 %v1956_v30, %v1848_v55 }
 0x3aa   : > { %v1849_v57 = vadd.f32 %v1818_v16, %v1718_v33  ;;  %v2183_v26 = vpop.permute.xlu1 %2182  ;;  %v2089_v60 = vadd.f32 %v4386_v20, %v1974_v29  ;;  %v2189_v43 = vpop.permute.xlu0 %2188  ;;  %v2094_v23 = vadd.f32 %v2071_v21, %v1979_v17 }
 0x3ab   : > { %v2199_v44 = vsel %vm2196_vm9, %v2181_v45, %v2183_v26  ;;  %v2201_v63 = vsel %vm2196_vm9, %v2189_v43, %v2191_v59 }
 0x3ac   : > { %v2220_v19 = vadd.f32 %v2183_v26, %v2089_v60  ;;  %v2223_v61 = vadd.f32 %v2201_v63, %v4372_v15  ;;  %v1980_v32 = vadd.f32 %v1949_v13, %v1849_v57  ;;  %v2219_v1 = vadd.f32 %v2199_v44, %v2088_v48 }
 0x3ae   : > { %v2268_v56 = vadd.f32 %v4092_v52, %v2220_v19  ;;  %v2271_v2 = vadd.f32 %v4106_v31, %v2223_v61  ;;  %v2195_v12 = vpop.permute.xlu1 %2194  ;;  %v2095_v20 = vadd.f32 %v4388_v0, %v1980_v32  ;;  %v2193_v8 = vpop.permute.xlu0 %2192  ;;  %v2267_v15 = vadd.f32 %v4092_v52, %v2219_v1 }
 0x3af   : > { %v2202_v59 = vsel %vm2196_vm9, %v2193_v8, %v2195_v12 }
 0x3b0   : > { %v2226_v37 = vadd.f32 %v2195_v12, %v2095_v20  ;;  %2297 = vrot.lane.b32.xlu1 %v2268_v56, %s2975_s23  ;;  %2303 = vrot.lane.b32.xlu0 %v2271_v2, %s2975_s23  ;;  %v2225_v5 = vadd.f32 %v2202_v59, %v2094_v23 }
 0x3b2   : > { %v2274_v31 = vadd.f32 %v4605_v3, %v2226_v37  ;;  %v2290_v38 = vpop.permute.xlu1 %2289  ;;  %v2288_v46 = vpop.permute.xlu0 %2287  ;;  %v2273_v52 = vadd.f32 %v4605_v3, %v2225_v5 }
 0x3b3   : > { %v2311_v16 = vsel %vm2196_vm9, %v2288_v46, %v2290_v38 }
 0x3b4   : > { %2323 = vst [vmem:[%s4430_s30] sm:$0xff] %v2311_v16  ;;  %2309 = vrot.lane.b32.xlu1 %v2274_v31, %s2975_s23  ;;  %2295 = vrot.lane.b32.xlu0 %v2267_v15, %s2975_s23 }
 0x3b6   : > { %v2302_v39 = vpop.permute.xlu1 %2301  ;;  %v2300_v0 = vpop.permute.xlu0 %2299 }
 0x3b7   : > { %v2314_v45 = vsel %vm2196_vm9, %v2300_v0, %v2302_v39 }
 0x3b8   : > { %2326 = vst [vmem:[%s4430_s30 + $0x18] sm:$0xff] %v2314_v45  ;;  %2307 = vrot.lane.b32.xlu0 %v2273_v52, %s2975_s23 }
 0x3e6   : > { %v2292_v10 = vpop.permute.xlu0 %2291 }
 0x3ea   : > { %v2294_v14 = vpop.permute.xlu1 %2293 }
 0x3eb   : > { %v2312_v27 = vsel %vm2196_vm9, %v2292_v10, %v2294_v14 }
 0x3ec   : > { %2324 = vst [vmem:[%s4430_s30 + $0x8] sm:$0xff] %v2312_v27 }
 0x40d   : > { %v2306_v50 = vpop.permute.xlu1 %2305 }
 0x422   : > { %v2304_v51 = vpop.permute.xlu0 %2303  ;;  %v2298_v47 = vpop.permute.xlu1 %2297 }
 0x423   : > { %v2315_v62 = vsel %vm2196_vm9, %v2304_v51, %v2306_v50 }
 0x424   : > { %2327 = vst [vmem:[%s4430_s30 + $0x20] sm:$0xff] %v2315_v62 }
 0x426   : > { %v2296_v4 = vpop.permute.xlu0 %2295  ;;  %v2310_v54 = vpop.permute.xlu1 %2309 }
 0x427   : > { %v2313_v35 = vsel %vm2196_vm9, %v2296_v4, %v2298_v47 }
 0x428   : > { %2325 = vst [vmem:[%s4430_s30 + $0x10] sm:$0xff] %v2313_v35 }
 0x42a   : > { %v2308_v36 = vpop.permute.xlu0 %2307 }
 0x42b   : > { %v2316_v24 = vsel %vm2196_vm9, %v2308_v36, %v2310_v54 }
 0x42c   : > { %2328 = vst [vmem:[%s4430_s30 + $0x28] sm:$0xff] %v2316_v24 }
 0x42d   : > { %2808 = shalt.err (!%p2805_p8)
}
 0x42e   : > { %s2809_s11 = scalar_lea.hbm %s4453_s12, 768  ;;  %s2813_s21 = scalar_lea.hbm %s4608_s20, 3072 }
 0x42f   : > { %p2810_p9 = scmp.ne.s32.totalorder %s4453_s12, %s2809_s11  ;;  %p2814_p5 = scmp.lt.u32.totalorder %s4453_s12, %s4608_s20 }
 0x430   : > { %p2815_p6 = scmp.lt.u32.totalorder %s2813_s21, %s2809_s11  ;;  %p2817_p1 = scmp.lt.u32.totalorder %s2809_s11, %s4453_s12 }
 0x431   : > { %p2811_p13 = pnand %p2810_p9, %p4609_p3 }
 0x432   : > { %p2816_p10 = por %p2815_p6, %p2814_p5 }
 0x433   : > { %p2812_p0 = pneg %p2811_p13 }
 0x434   : > { %p2818_p11 = por %p2817_p1, %p2816_p10 }
 0x436   : > { %p2819_p12 = pnand %p2818_p11, %p2812_p0 }
 0x438   : > { %2822 = shalt.err (!%p2819_p12)
}
 0x439   : > { %s2977_s22 = smov 128   ;;  %s2978_s19 = smov 256  }
 0x43a   : > { %s2979_s7 = smov 8  }
 0x43b   : > { %2568 = dma.vmem_to_hbm [thread:$0]  (%p4609_p3), %s4447_s16, 768, %s4453_s12, %s2330_s10, %s2977_s22, %s2978_s19, %s2979_s7  }
 0x43c PF: > { %s4610_s1 = sld [smem:[#allocation13_spill]]  ;;  %s4611_s28 = sld [smem:[#allocation24_spill]] }
 0x43d   : > { %p2574_p7 = scmp.ge.s32.totalorder %s2949_s14, 2 }
 0x442   : > { %s2359_s25 = sand.u32 1, %s4610_s1   ;;  %p4612_p4 = scmp.ne.s32.totalorder %s4611_s28, 0 }
 0x443   : > { %s2360_s15 = scalar_lea.sflag [#allocation6], %s2359_s25 }
 0x444   : > { %p2571_p2 = pnand %p2574_p7, %p4612_p4 }
 0x446   : > { %2888 = dma.done.wait (!%p2571_p2), %s2360_s15, 768  }
 0x447   : > { %2890 = vsyncadd (!%p2571_p2), %s2360_s15, 4294966528  ;;  %s26_s14 = sadd.s32 1, %s2949_s14   ;;  %s4614_s0 = sld [smem:[#allocation22_spill]] }
 0x448   : > { %p4486_p8 = scmp.ge.s32.totalorder %s26_s14, 6   ;;  %s4615_s18 = sld [smem:[#allocation14_spill]] }
 0x449   : > { %s4616_s30 = sld [smem:[#allocation21_spill]]  ;;  %s4617_s16 = sld [smem:[#allocation15_spill]] }
 0x44a   : > { %s4618_s9 = sld [smem:[#allocation20_spill]]  ;;  %s4619_s10 = sld [smem:[#allocation17_spill]] }
 0x44b   : > { %s4620_s12 = sld [smem:[#allocation18_spill]]  ;;  %s4621_s23 = sld [smem:[#allocation19_spill]] }
 0x44c   : > { %s4623_s24 = smov %s2925_s8  ;;  %s4624_s25 = smov %s2905_s26 }
 0x44d   : > { %s4625_s26 = smov %s2909_s27  ;;  %s4626_s27 = smov %s4614_s0 }
 0x44e   : > { %s4627_s28 = smov %s2917_s29  ;;  %s4628_s29 = smov %s4615_s18 }
 0x44f   : > { %s4629_s8 = smov %s4617_s16  ;;  %s4630_s11 = smov %s2945_s13 }
 0x450   :  { %25 = sbr.rel (!%p4486_p8) target bundleno = 16 (0x10), region = 160 }
 0x451   : > { %s4631_s13 = smov %s4621_s23 }
 0x457   :  { %2365 = vsyncpa [#allocation5], 1 }
 0x458   :  { %2367 = vsyncpa [#allocation5 + $0x1], 1 }
 0x459   :  { %2368 = vsyncpa [#allocation8], 1 }
 0x45a   :  { %2370 = vsyncpa [#allocation8 + $0x1], 1 }
 0x45b   :  { %2371 = vsyncpa [#allocation6], 1 }
 0x45c   :  { %2373 = vsyncpa [#allocation6 + $0x1], 1 }

</bundles_post_ra>
